<compile_context>
chip_gen: v6e
topology: v6e:2x2x1
jax: 0.10.0
libtpu: 0.0.40
codegen_flags: <defaults>
</compile_context>

<pallas_src>
import jax
import jax.numpy as jnp
from jax import lax
from jax.experimental import pallas as pl
from jax.experimental.pallas import tpu as pltpu

HIDDEN = 32
EMB = 128
VOCAB = 128
FC1 = 256
NCLASS = 3
GATES = 4 * HIDDEN     # 128 lanes: [i | f | g | o]
OUT_PAD = 128          # lane-dense classifier output width
NEG_INF = -1e30


def surname_lstm_kernel(idx_ref, wei_ref, whh_ref, b_ref,
                        w1_ref, b1_ref, w2_ref, b2_ref, out_ref, gx_ref):
    """All input refs are full-array VMEM blocks.

    idx_ref : (seq*B, 1)   int32   time-major flattened token ids
    wei_ref : (VOCAB, 4H)  f32     Emb @ W_ih^T, g-columns pre-scaled by 2
    whh_ref : (128, 4H)    bf16    W_hh^T in rows 32:64 (g-cols x2), 0 elsewhere
    b_ref   : (1, 4H)      f32     b_ih + b_hh, g-lanes pre-scaled by 2
    w1_ref  : (128, FC1)   f32     fc1 weight^T in rows 32:64, 0 elsewhere
    b1_ref  : (1, FC1)     f32
    w2_ref  : (FC1, 128)   f32     zero-padded from 3 -> 128 columns
    b2_ref  : (1, 128)     f32     padded lanes hold -1e30
    out_ref : (B, 128)     f32     softmax probs (first 3 lanes valid)
    gx_ref  : (seq*B, 4H)  f32     VMEM scratch for per-step gate pre-acts
    """
    sb = idx_ref.shape[0]
    bpad = out_ref.shape[0]
    seq = sb // bpad

    # ---------------- Prologue (off the recurrent critical path) ----------
    # Fused embedding lookup + input projection for EVERY timestep in one
    # MXU push; gate bias folded in here (f32) instead of per step.
    onehot = (lax.broadcasted_iota(jnp.int32, (sb, VOCAB), 1)
              == idx_ref[...]).astype(jnp.float32)                # (sb, VOCAB)
    gx_ref[...] = (jnp.dot(onehot, wei_ref[...],
                           preferred_element_type=jnp.float32)
                   + b_ref[...])                                  # (sb, 4H)

    # Hoisted lane constants: tanh(g) = 2*sigmoid(2g) - 1 on the g block.
    lane = lax.broadcasted_iota(jnp.int32, (bpad, GATES), 1)
    is_g = (lane >= 2 * HIDDEN) & (lane < 3 * HIDDEN)
    gsc = jnp.where(is_g, 2.0, 1.0).astype(jnp.float32)
    gof = jnp.where(is_g, -1.0, 0.0).astype(jnp.float32)

    whh = whh_ref[...]                                            # (128, 4H) bf16

    # h / c live in lanes 32:64 of full (bpad, 128) tiles.
    h_full = jnp.zeros((bpad, GATES), jnp.float32)
    c_full = jnp.zeros((bpad, GATES), jnp.float32)

    # ---------------- Fully-unrolled recurrence (seq is static) -----------
    for t in range(seq):
        gx = gx_ref[t * bpad:(t + 1) * bpad, :]                   # vld (free slot)
        gates = gx + jnp.dot(h_full.astype(jnp.bfloat16), whh,
                             preferred_element_type=jnp.float32)  # (bpad, 4H)
        sig = jax.nn.sigmoid(gates)          # single EUP push on the gate tile
        act = sig * gsc + gof                # [ i | f | tanh(g) | o ]
        r64 = pltpu.roll(act, shift=64, axis=1)        # [ g | o | i | f ]
        ig = pltpu.roll(act * r64, shift=32, axis=1)   # lanes 32:64: i*tanh(g)
        c_full = act * c_full + ig                     # lanes 32:64: f*c + i*g
        h_full = r64 * jnp.tanh(c_full)                # lanes 32:64: o*tanh(c)

    # ---------------- Epilogue (one-time, f32) -----------------------------
    # fc1 + sigmoid: padded w1 (zero rows outside 32:64) extracts h implicitly.
    z1 = jax.nn.sigmoid(
        jnp.dot(h_full, w1_ref[...], preferred_element_type=jnp.float32)
        + b1_ref[...])                                            # (bpad, FC1)
    # fc2, lane-dense (padded to 128 output lanes, pad logits at -1e30)
    z2 = (jnp.dot(z1, w2_ref[...], preferred_element_type=jnp.float32)
          + b2_ref[...])                                          # (bpad, 128)
    # dropout: identity (eval mode)
    # softmax over 128 lanes in f32; padded lanes underflow to 0 in exp
    z2 = z2 - jnp.max(z2, axis=-1, keepdims=True)
    e = jnp.exp(z2)
    s = jnp.sum(e, axis=-1, keepdims=True)
    inv = pl.reciprocal(s, approx=True)      # EUP
    inv = inv * (2.0 - s * inv)              # one Newton step -> ~f32-exact
    out_ref[...] = e * inv


def prepare_params(params):
    """One-time weight prep: emb/W_ih fusion, g-gate x2 prescale, bias fold,
    lane-embedding pads, classifier lane padding."""
    gscale = jnp.ones((GATES,), jnp.float32).at[2 * HIDDEN:3 * HIDDEN].set(2.0)

    emb = params["emb"].astype(jnp.float32)                       # (VOCAB, EMB)
    w_emb_ih = jnp.dot(emb, params["w_ih"].T.astype(jnp.float32)) # (VOCAB, 4H)
    w_emb_ih = w_emb_ih * gscale[None, :]                         # f32 (parity)

    whh = (params["w_hh"].T.astype(jnp.float32) * gscale[None, :])  # (H, 4H)
    whh_pad = jnp.zeros((GATES, GATES), jnp.bfloat16)
    whh_pad = whh_pad.at[HIDDEN:2 * HIDDEN, :].set(whh.astype(jnp.bfloat16))

    b = ((params["b_ih"] + params["b_hh"]).astype(jnp.float32)
         * gscale).reshape(1, GATES)

    w1_pad = jnp.zeros((GATES, FC1), jnp.float32)
    w1_pad = w1_pad.at[HIDDEN:2 * HIDDEN, :].set(params["w1"].T)

    w2_pad = jnp.zeros((FC1, OUT_PAD), jnp.float32)
    w2_pad = w2_pad.at[:, :NCLASS].set(params["w2"].T)
    b2_pad = jnp.full((1, OUT_PAD), NEG_INF, jnp.float32)
    b2_pad = b2_pad.at[0, :NCLASS].set(params["b2"])

    return {
        "w_emb_ih": w_emb_ih,                                     # (VOCAB, 4H) f32
        "whh": whh_pad,                                           # (128, 4H) bf16
        "b": b,                                                   # (1, 4H) f32
        "w1": w1_pad,                                             # (128, FC1) f32
        "b1": params["b1"].reshape(1, FC1).astype(jnp.float32),
        "w2": w2_pad,                                             # (FC1, 128) f32
        "b2": b2_pad,                                             # (1, 128) f32
    }


@jax.jit
def surname_lstm_forward(indices, prepared):
    """indices: (batch, seq) int32 in [0, VOCAB). Returns (batch, 3) probs."""
    batch, seq = indices.shape
    bpad = ((batch + 7) // 8) * 8            # sublane-align the batch dim
    idx_t = indices.T.astype(jnp.int32)                           # (seq, batch)
    idx_t = jnp.pad(idx_t, ((0, 0), (0, bpad - batch)))           # (seq, bpad)
    idx = idx_t.reshape(seq * bpad, 1)                            # time-major

    vmem_spec = pl.BlockSpec(memory_space=pltpu.MemorySpace.VMEM)
    # NOTE: monolithic (no grid) — right choice for single-TC v5e/v6e and for
    # small batches; larger batches just widen the sublane dimension of every
    # per-step tile (free M on the MXU).  For very large batch on v7x, add a
    # "parallel" batch-tile grid axis so both TensorCores are used.
    out = pl.pallas_call(
        surname_lstm_kernel,
        out_shape=jax.ShapeDtypeStruct((bpad, OUT_PAD), jnp.float32),
        in_specs=[vmem_spec] * 8,
        out_specs=vmem_spec,
        scratch_shapes=[pltpu.VMEM((seq * bpad, GATES), jnp.float32)],
        compiler_params=pltpu.CompilerParams(vmem_limit_bytes=32 * 1024 * 1024),
    )(idx, prepared["w_emb_ih"], prepared["whh"], prepared["b"],
      prepared["w1"], prepared["b1"], prepared["w2"], prepared["b2"])
    return out[:batch, :NCLASS]


def reference_forward(indices, params):
    """Pure-JAX fp32 reference matching the PyTorch module (eval mode)."""
    emb = params["emb"][indices]                                  # (B, S, EMB)
    batch, seq = indices.shape
    h = jnp.zeros((batch, HIDDEN), jnp.float32)
    c = jnp.zeros((batch, HIDDEN), jnp.float32)
    for t in range(seq):
        x = emb[:, t, :]
        g = (x @ params["w_ih"].T + params["b_ih"]
             + h @ params["w_hh"].T + params["b_hh"])
        i_g = jax.nn.sigmoid(g[:, 0 * HIDDEN:1 * HIDDEN])
        f_g = jax.nn.sigmoid(g[:, 1 * HIDDEN:2 * HIDDEN])
        g_g = jnp.tanh(g[:, 2 * HIDDEN:3 * HIDDEN])
        o_g = jax.nn.sigmoid(g[:, 3 * HIDDEN:4 * HIDDEN])
        c = f_g * c + i_g * g_g
        h = o_g * jnp.tanh(c)
    z1 = jax.nn.sigmoid(h @ params["w1"].T + params["b1"])
    z2 = z1 @ params["w2"].T + params["b2"]
    return jax.nn.softmax(z2, axis=-1)


def init_params(key):
    ks = jax.random.split(key, 9)
    k_lstm = 1.0 / jnp.sqrt(HIDDEN)
    k_fc1 = 1.0 / jnp.sqrt(HIDDEN)
    k_fc2 = 1.0 / jnp.sqrt(FC1)
    u = lambda k, shape, lim: jax.random.uniform(k, shape, jnp.float32, -lim, lim)
    return {
        "emb": jax.random.normal(ks[0], (VOCAB, EMB), jnp.float32),
        "w_ih": u(ks[1], (4 * HIDDEN, EMB), k_lstm),
        "w_hh": u(ks[2], (4 * HIDDEN, HIDDEN), k_lstm),
        "b_ih": u(ks[3], (4 * HIDDEN,), k_lstm),
        "b_hh": u(ks[4], (4 * HIDDEN,), k_lstm),
        "w1": u(ks[5], (FC1, HIDDEN), k_fc1),
        "b1": u(ks[6], (FC1,), k_fc1),
        "w2": u(ks[7], (NCLASS, FC1), k_fc2),
        "b2": u(ks[8], (NCLASS,), k_fc2),
    }


if __name__ == "__main__":
    key = jax.random.PRNGKey(0)
    k_param, k_idx = jax.random.split(key)
    params = init_params(k_param)
    prepared = prepare_params(params)   # one-time weight prep, outside fwd path

    batch, seq = 2, 8
    indices = jax.random.randint(k_idx, (batch, seq), 0, VOCAB, dtype=jnp.int32)

    # TODO(synk): dropout is identity here (eval mode); training-mode dropout
    # would need pltpu.prng_seed/prng_random_bits inside the kernel.
    out = surname_lstm_forward(indices, prepared)
    out = jax.block_until_ready(out)

    ref = reference_forward(indices, params)

    assert out.shape == (batch, NCLASS)
    assert bool(jnp.all(out >= 0.0)) and bool(jnp.all(out <= 1.0 + 1e-4))
    assert bool(jnp.allclose(jnp.sum(out, axis=-1), 1.0, atol=1e-3))
    assert bool(jnp.allclose(out, ref, atol=2e-2))
    print("KERNEL_OK")
</pallas_src>

<mosaic_0001>
module attributes {stable_mosaic.version = 11 : i64} {
  func.func @surname_lstm_kernel(%arg0: memref<64x1xi32, #tpu.memory_space<vmem>>, %arg1: memref<128x128xf32, #tpu.memory_space<vmem>>, %arg2: memref<128x128xbf16, #tpu.memory_space<vmem>>, %arg3: memref<1x128xf32, #tpu.memory_space<vmem>>, %arg4: memref<128x256xf32, #tpu.memory_space<vmem>>, %arg5: memref<1x256xf32, #tpu.memory_space<vmem>>, %arg6: memref<256x128xf32, #tpu.memory_space<vmem>>, %arg7: memref<1x128xf32, #tpu.memory_space<vmem>>, %arg8: memref<8x128xf32, #tpu.memory_space<vmem>>, %arg9: memref<64x128xf32, #tpu.memory_space<vmem>>) attributes {dimension_semantics = [], scalar_prefetch = 0 : i64, scratch_operands = 1 : i64, tpu.core_type = #tpu.core_type<tc>} {
    %0 = tpu.iota {dimensions = array<i32: 1>} : vector<64x128xi32>
    %c0 = arith.constant 0 : index
    %c0_0 = arith.constant 0 : index
    %1 = vector.load %arg0[%c0, %c0_0] : memref<64x1xi32, #tpu.memory_space<vmem>>, vector<64x1xi32>
    %2 = vector.broadcast %1 : vector<64x1xi32> to vector<64x128xi32>
    %3 = arith.cmpi eq, %0, %2 : vector<64x128xi32>
    %4 = arith.extui %3 : vector<64x128xi1> to vector<64x128xi32>
    %5 = arith.sitofp %4 : vector<64x128xi32> to vector<64x128xf32>
    %c0_1 = arith.constant 0 : index
    %c0_2 = arith.constant 0 : index
    %6 = vector.load %arg1[%c0_1, %c0_2] : memref<128x128xf32, #tpu.memory_space<vmem>>, vector<128x128xf32>
    %cst = arith.constant dense<0.000000e+00> : vector<64x128xf32>
    %7 = tpu.matmul %5, %6, %cst {dimension_numbers = #tpu.dot_dimension_numbers<[1], [0], [0], [1], [0, 0, 1, 1], [], []>} : vector<64x128xf32>, vector<128x128xf32>, vector<64x128xf32> -> vector<64x128xf32>
    %c0_3 = arith.constant 0 : index
    %c0_4 = arith.constant 0 : index
    %8 = vector.load %arg3[%c0_3, %c0_4] : memref<1x128xf32, #tpu.memory_space<vmem>>, vector<1x128xf32>
    %9 = vector.broadcast %8 : vector<1x128xf32> to vector<64x128xf32>
    %10 = arith.addf %7, %9 : vector<64x128xf32>
    %c0_5 = arith.constant 0 : index
    %c0_6 = arith.constant 0 : index
    %11 = vector.load %arg9[%c0_5, %c0_6] : memref<64x128xf32, #tpu.memory_space<vmem>>, vector<64x128xf32>
    tpu.vector_store %arg9[%c0_5, %c0_6], %10 {strides = array<i32>} : memref<64x128xf32, #tpu.memory_space<vmem>>, vector<64x128xf32>,
    %12 = tpu.iota {dimensions = array<i32: 1>} : vector<8x128xi32>
    %c64_i32 = arith.constant 64 : i32
    %13 = vector.broadcast %c64_i32 : i32 to vector<8x128xi32>
    %14 = arith.cmpi sge, %12, %13 : vector<8x128xi32>
    %c96_i32 = arith.constant 96 : i32
    %15 = vector.broadcast %c96_i32 : i32 to vector<8x128xi32>
    %16 = arith.cmpi slt, %12, %15 : vector<8x128xi32>
    %17 = arith.andi %14, %16 : vector<8x128xi1>
    %cst_7 = arith.constant 2.000000e+00 : f32
    %cst_8 = arith.constant 1.000000e+00 : f32
    %18 = vector.broadcast %cst_7 : f32 to vector<8x128xf32>
    %19 = vector.broadcast %cst_8 : f32 to vector<8x128xf32>
    %20 = arith.select %17, %18, %19 : vector<8x128xi1>, vector<8x128xf32>
    %cst_9 = arith.constant -1.000000e+00 : f32
    %cst_10 = arith.constant 0.000000e+00 : f32
    %21 = vector.broadcast %cst_9 : f32 to vector<8x128xf32>
    %22 = vector.broadcast %cst_10 : f32 to vector<8x128xf32>
    %23 = arith.select %17, %21, %22 : vector<8x128xi1>, vector<8x128xf32>
    %c0_11 = arith.constant 0 : index
    %c0_12 = arith.constant 0 : index
    %24 = vector.load %arg2[%c0_11, %c0_12] : memref<128x128xbf16, #tpu.memory_space<vmem>>, vector<128x128xbf16>
    %cst_13 = arith.constant 0.000000e+00 : f32
    %25 = vector.broadcast %cst_13 : f32 to vector<8x128xf32>
    %cst_14 = arith.constant 0.000000e+00 : f32
    %26 = vector.broadcast %cst_14 : f32 to vector<8x128xf32>
    %c0_15 = arith.constant 0 : index
    %c0_16 = arith.constant 0 : index
    %27 = vector.load %arg9[%c0_15, %c0_16] : memref<64x128xf32, #tpu.memory_space<vmem>>, vector<8x128xf32>
    %28 = arith.truncf %25 : vector<8x128xf32> to vector<8x128xbf16>
    %cst_17 = arith.constant dense<0.000000e+00> : vector<8x128xf32>
    %29 = tpu.matmul %28, %24, %cst_17 {dimension_numbers = #tpu.dot_dimension_numbers<[1], [0], [0], [1], [0, 0, 1, 1], [], []>} : vector<8x128xbf16>, vector<128x128xbf16>, vector<8x128xf32> -> vector<8x128xf32>
    %30 = arith.addf %27, %29 : vector<8x128xf32>
    %31 = arith.negf %30 : vector<8x128xf32>
    %32 = math.exp %31 : vector<8x128xf32>
    %cst_18 = arith.constant 1.000000e+00 : f32
    %33 = vector.broadcast %cst_18 : f32 to vector<8x128xf32>
    %34 = arith.addf %33, %32 : vector<8x128xf32>
    %35 = arith.divf %33, %34 : vector<8x128xf32>
    %36 = arith.mulf %35, %20 : vector<8x128xf32>
    %37 = arith.addf %36, %23 : vector<8x128xf32>
    %c64_i32_19 = arith.constant 64 : i32
    %38 = tpu.dynamic_rotate %37 by %c64_i32_19 dim 1 : vector<8x128xf32>, i32 -> vector<8x128xf32>
    %39 = arith.mulf %37, %38 : vector<8x128xf32>
    %c32_i32 = arith.constant 32 : i32
    %40 = tpu.dynamic_rotate %39 by %c32_i32 dim 1 : vector<8x128xf32>, i32 -> vector<8x128xf32>
    %41 = arith.mulf %37, %26 : vector<8x128xf32>
    %42 = arith.addf %41, %40 : vector<8x128xf32>
    %43 = math.tanh %42 : vector<8x128xf32>
    %44 = arith.mulf %38, %43 : vector<8x128xf32>
    %c8 = arith.constant 8 : index
    %c0_20 = arith.constant 0 : index
    %45 = vector.load %arg9[%c8, %c0_20] : memref<64x128xf32, #tpu.memory_space<vmem>>, vector<8x128xf32>
    %46 = arith.truncf %44 : vector<8x128xf32> to vector<8x128xbf16>
    %cst_21 = arith.constant dense<0.000000e+00> : vector<8x128xf32>
    %47 = tpu.matmul %46, %24, %cst_21 {dimension_numbers = #tpu.dot_dimension_numbers<[1], [0], [0], [1], [0, 0, 1, 1], [], []>} : vector<8x128xbf16>, vector<128x128xbf16>, vector<8x128xf32> -> vector<8x128xf32>
    %48 = arith.addf %45, %47 : vector<8x128xf32>
    %49 = arith.negf %48 : vector<8x128xf32>
    %50 = math.exp %49 : vector<8x128xf32>
    %cst_22 = arith.constant 1.000000e+00 : f32
    %51 = vector.broadcast %cst_22 : f32 to vector<8x128xf32>
    %52 = arith.addf %51, %50 : vector<8x128xf32>
    %53 = arith.divf %51, %52 : vector<8x128xf32>
    %54 = arith.mulf %53, %20 : vector<8x128xf32>
    %55 = arith.addf %54, %23 : vector<8x128xf32>
    %c64_i32_23 = arith.constant 64 : i32
    %56 = tpu.dynamic_rotate %55 by %c64_i32_23 dim 1 : vector<8x128xf32>, i32 -> vector<8x128xf32>
    %57 = arith.mulf %55, %56 : vector<8x128xf32>
    %c32_i32_24 = arith.constant 32 : i32
    %58 = tpu.dynamic_rotate %57 by %c32_i32_24 dim 1 : vector<8x128xf32>, i32 -> vector<8x128xf32>
    %59 = arith.mulf %55, %42 : vector<8x128xf32>
    %60 = arith.addf %59, %58 : vector<8x128xf32>
    %61 = math.tanh %60 : vector<8x128xf32>
    %62 = arith.mulf %56, %61 : vector<8x128xf32>
    %c16 = arith.constant 16 : index
    %c0_25 = arith.constant 0 : index
    %63 = vector.load %arg9[%c16, %c0_25] : memref<64x128xf32, #tpu.memory_space<vmem>>, vector<8x128xf32>
    %64 = arith.truncf %62 : vector<8x128xf32> to vector<8x128xbf16>
    %cst_26 = arith.constant dense<0.000000e+00> : vector<8x128xf32>
    %65 = tpu.matmul %64, %24, %cst_26 {dimension_numbers = #tpu.dot_dimension_numbers<[1], [0], [0], [1], [0, 0, 1, 1], [], []>} : vector<8x128xbf16>, vector<128x128xbf16>, vector<8x128xf32> -> vector<8x128xf32>
    %66 = arith.addf %63, %65 : vector<8x128xf32>
    %67 = arith.negf %66 : vector<8x128xf32>
    %68 = math.exp %67 : vector<8x128xf32>
    %cst_27 = arith.constant 1.000000e+00 : f32
    %69 = vector.broadcast %cst_27 : f32 to vector<8x128xf32>
    %70 = arith.addf %69, %68 : vector<8x128xf32>
    %71 = arith.divf %69, %70 : vector<8x128xf32>
    %72 = arith.mulf %71, %20 : vector<8x128xf32>
    %73 = arith.addf %72, %23 : vector<8x128xf32>
    %c64_i32_28 = arith.constant 64 : i32
    %74 = tpu.dynamic_rotate %73 by %c64_i32_28 dim 1 : vector<8x128xf32>, i32 -> vector<8x128xf32>
    %75 = arith.mulf %73, %74 : vector<8x128xf32>
    %c32_i32_29 = arith.constant 32 : i32
    %76 = tpu.dynamic_rotate %75 by %c32_i32_29 dim 1 : vector<8x128xf32>, i32 -> vector<8x128xf32>
    %77 = arith.mulf %73, %60 : vector<8x128xf32>
    %78 = arith.addf %77, %76 : vector<8x128xf32>
    %79 = math.tanh %78 : vector<8x128xf32>
    %80 = arith.mulf %74, %79 : vector<8x128xf32>
    %c24 = arith.constant 24 : index
    %c0_30 = arith.constant 0 : index
    %81 = vector.load %arg9[%c24, %c0_30] : memref<64x128xf32, #tpu.memory_space<vmem>>, vector<8x128xf32>
    %82 = arith.truncf %80 : vector<8x128xf32> to vector<8x128xbf16>
    %cst_31 = arith.constant dense<0.000000e+00> : vector<8x128xf32>
    %83 = tpu.matmul %82, %24, %cst_31 {dimension_numbers = #tpu.dot_dimension_numbers<[1], [0], [0], [1], [0, 0, 1, 1], [], []>} : vector<8x128xbf16>, vector<128x128xbf16>, vector<8x128xf32> -> vector<8x128xf32>
    %84 = arith.addf %81, %83 : vector<8x128xf32>
    %85 = arith.negf %84 : vector<8x128xf32>
    %86 = math.exp %85 : vector<8x128xf32>
    %cst_32 = arith.constant 1.000000e+00 : f32
    %87 = vector.broadcast %cst_32 : f32 to vector<8x128xf32>
    %88 = arith.addf %87, %86 : vector<8x128xf32>
    %89 = arith.divf %87, %88 : vector<8x128xf32>
    %90 = arith.mulf %89, %20 : vector<8x128xf32>
    %91 = arith.addf %90, %23 : vector<8x128xf32>
    %c64_i32_33 = arith.constant 64 : i32
    %92 = tpu.dynamic_rotate %91 by %c64_i32_33 dim 1 : vector<8x128xf32>, i32 -> vector<8x128xf32>
    %93 = arith.mulf %91, %92 : vector<8x128xf32>
    %c32_i32_34 = arith.constant 32 : i32
    %94 = tpu.dynamic_rotate %93 by %c32_i32_34 dim 1 : vector<8x128xf32>, i32 -> vector<8x128xf32>
    %95 = arith.mulf %91, %78 : vector<8x128xf32>
    %96 = arith.addf %95, %94 : vector<8x128xf32>
    %97 = math.tanh %96 : vector<8x128xf32>
    %98 = arith.mulf %92, %97 : vector<8x128xf32>
    %c32 = arith.constant 32 : index
    %c0_35 = arith.constant 0 : index
    %99 = vector.load %arg9[%c32, %c0_35] : memref<64x128xf32, #tpu.memory_space<vmem>>, vector<8x128xf32>
    %100 = arith.truncf %98 : vector<8x128xf32> to vector<8x128xbf16>
    %cst_36 = arith.constant dense<0.000000e+00> : vector<8x128xf32>
    %101 = tpu.matmul %100, %24, %cst_36 {dimension_numbers = #tpu.dot_dimension_numbers<[1], [0], [0], [1], [0, 0, 1, 1], [], []>} : vector<8x128xbf16>, vector<128x128xbf16>, vector<8x128xf32> -> vector<8x128xf32>
    %102 = arith.addf %99, %101 : vector<8x128xf32>
    %103 = arith.negf %102 : vector<8x128xf32>
    %104 = math.exp %103 : vector<8x128xf32>
    %cst_37 = arith.constant 1.000000e+00 : f32
    %105 = vector.broadcast %cst_37 : f32 to vector<8x128xf32>
    %106 = arith.addf %105, %104 : vector<8x128xf32>
    %107 = arith.divf %105, %106 : vector<8x128xf32>
    %108 = arith.mulf %107, %20 : vector<8x128xf32>
    %109 = arith.addf %108, %23 : vector<8x128xf32>
    %c64_i32_38 = arith.constant 64 : i32
    %110 = tpu.dynamic_rotate %109 by %c64_i32_38 dim 1 : vector<8x128xf32>, i32 -> vector<8x128xf32>
    %111 = arith.mulf %109, %110 : vector<8x128xf32>
    %c32_i32_39 = arith.constant 32 : i32
    %112 = tpu.dynamic_rotate %111 by %c32_i32_39 dim 1 : vector<8x128xf32>, i32 -> vector<8x128xf32>
    %113 = arith.mulf %109, %96 : vector<8x128xf32>
    %114 = arith.addf %113, %112 : vector<8x128xf32>
    %115 = math.tanh %114 : vector<8x128xf32>
    %116 = arith.mulf %110, %115 : vector<8x128xf32>
    %c40 = arith.constant 40 : index
    %c0_40 = arith.constant 0 : index
    %117 = vector.load %arg9[%c40, %c0_40] : memref<64x128xf32, #tpu.memory_space<vmem>>, vector<8x128xf32>
    %118 = arith.truncf %116 : vector<8x128xf32> to vector<8x128xbf16>
    %cst_41 = arith.constant dense<0.000000e+00> : vector<8x128xf32>
    %119 = tpu.matmul %118, %24, %cst_41 {dimension_numbers = #tpu.dot_dimension_numbers<[1], [0], [0], [1], [0, 0, 1, 1], [], []>} : vector<8x128xbf16>, vector<128x128xbf16>, vector<8x128xf32> -> vector<8x128xf32>
    %120 = arith.addf %117, %119 : vector<8x128xf32>
    %121 = arith.negf %120 : vector<8x128xf32>
    %122 = math.exp %121 : vector<8x128xf32>
    %cst_42 = arith.constant 1.000000e+00 : f32
    %123 = vector.broadcast %cst_42 : f32 to vector<8x128xf32>
    %124 = arith.addf %123, %122 : vector<8x128xf32>
    %125 = arith.divf %123, %124 : vector<8x128xf32>
    %126 = arith.mulf %125, %20 : vector<8x128xf32>
    %127 = arith.addf %126, %23 : vector<8x128xf32>
    %c64_i32_43 = arith.constant 64 : i32
    %128 = tpu.dynamic_rotate %127 by %c64_i32_43 dim 1 : vector<8x128xf32>, i32 -> vector<8x128xf32>
    %129 = arith.mulf %127, %128 : vector<8x128xf32>
    %c32_i32_44 = arith.constant 32 : i32
    %130 = tpu.dynamic_rotate %129 by %c32_i32_44 dim 1 : vector<8x128xf32>, i32 -> vector<8x128xf32>
    %131 = arith.mulf %127, %114 : vector<8x128xf32>
    %132 = arith.addf %131, %130 : vector<8x128xf32>
    %133 = math.tanh %132 : vector<8x128xf32>
    %134 = arith.mulf %128, %133 : vector<8x128xf32>
    %c48 = arith.constant 48 : index
    %c0_45 = arith.constant 0 : index
    %135 = vector.load %arg9[%c48, %c0_45] : memref<64x128xf32, #tpu.memory_space<vmem>>, vector<8x128xf32>
    %136 = arith.truncf %134 : vector<8x128xf32> to vector<8x128xbf16>
    %cst_46 = arith.constant dense<0.000000e+00> : vector<8x128xf32>
    %137 = tpu.matmul %136, %24, %cst_46 {dimension_numbers = #tpu.dot_dimension_numbers<[1], [0], [0], [1], [0, 0, 1, 1], [], []>} : vector<8x128xbf16>, vector<128x128xbf16>, vector<8x128xf32> -> vector<8x128xf32>
    %138 = arith.addf %135, %137 : vector<8x128xf32>
    %139 = arith.negf %138 : vector<8x128xf32>
    %140 = math.exp %139 : vector<8x128xf32>
    %cst_47 = arith.constant 1.000000e+00 : f32
    %141 = vector.broadcast %cst_47 : f32 to vector<8x128xf32>
    %142 = arith.addf %141, %140 : vector<8x128xf32>
    %143 = arith.divf %141, %142 : vector<8x128xf32>
    %144 = arith.mulf %143, %20 : vector<8x128xf32>
    %145 = arith.addf %144, %23 : vector<8x128xf32>
    %c64_i32_48 = arith.constant 64 : i32
    %146 = tpu.dynamic_rotate %145 by %c64_i32_48 dim 1 : vector<8x128xf32>, i32 -> vector<8x128xf32>
    %147 = arith.mulf %145, %146 : vector<8x128xf32>
    %c32_i32_49 = arith.constant 32 : i32
    %148 = tpu.dynamic_rotate %147 by %c32_i32_49 dim 1 : vector<8x128xf32>, i32 -> vector<8x128xf32>
    %149 = arith.mulf %145, %132 : vector<8x128xf32>
    %150 = arith.addf %149, %148 : vector<8x128xf32>
    %151 = math.tanh %150 : vector<8x128xf32>
    %152 = arith.mulf %146, %151 : vector<8x128xf32>
    %c56 = arith.constant 56 : index
    %c0_50 = arith.constant 0 : index
    %153 = vector.load %arg9[%c56, %c0_50] : memref<64x128xf32, #tpu.memory_space<vmem>>, vector<8x128xf32>
    %154 = arith.truncf %152 : vector<8x128xf32> to vector<8x128xbf16>
    %cst_51 = arith.constant dense<0.000000e+00> : vector<8x128xf32>
    %155 = tpu.matmul %154, %24, %cst_51 {dimension_numbers = #tpu.dot_dimension_numbers<[1], [0], [0], [1], [0, 0, 1, 1], [], []>} : vector<8x128xbf16>, vector<128x128xbf16>, vector<8x128xf32> -> vector<8x128xf32>
    %156 = arith.addf %153, %155 : vector<8x128xf32>
    %157 = arith.negf %156 : vector<8x128xf32>
    %158 = math.exp %157 : vector<8x128xf32>
    %cst_52 = arith.constant 1.000000e+00 : f32
    %159 = vector.broadcast %cst_52 : f32 to vector<8x128xf32>
    %160 = arith.addf %159, %158 : vector<8x128xf32>
    %161 = arith.divf %159, %160 : vector<8x128xf32>
    %162 = arith.mulf %161, %20 : vector<8x128xf32>
    %163 = arith.addf %162, %23 : vector<8x128xf32>
    %c64_i32_53 = arith.constant 64 : i32
    %164 = tpu.dynamic_rotate %163 by %c64_i32_53 dim 1 : vector<8x128xf32>, i32 -> vector<8x128xf32>
    %165 = arith.mulf %163, %164 : vector<8x128xf32>
    %c32_i32_54 = arith.constant 32 : i32
    %166 = tpu.dynamic_rotate %165 by %c32_i32_54 dim 1 : vector<8x128xf32>, i32 -> vector<8x128xf32>
    %167 = arith.mulf %163, %150 : vector<8x128xf32>
    %168 = arith.addf %167, %166 : vector<8x128xf32>
    %169 = math.tanh %168 : vector<8x128xf32>
    %170 = arith.mulf %164, %169 : vector<8x128xf32>
    %c0_55 = arith.constant 0 : index
    %c0_56 = arith.constant 0 : index
    %171 = vector.load %arg4[%c0_55, %c0_56] : memref<128x256xf32, #tpu.memory_space<vmem>>, vector<128x256xf32>
    %cst_57 = arith.constant dense<0.000000e+00> : vector<8x256xf32>
    %172 = tpu.matmul %170, %171, %cst_57 {dimension_numbers = #tpu.dot_dimension_numbers<[1], [0], [0], [1], [0, 0, 1, 1], [], []>} : vector<8x128xf32>, vector<128x256xf32>, vector<8x256xf32> -> vector<8x256xf32>
    %c0_58 = arith.constant 0 : index
    %c0_59 = arith.constant 0 : index
    %173 = vector.load %arg5[%c0_58, %c0_59] : memref<1x256xf32, #tpu.memory_space<vmem>>, vector<1x256xf32>
    %174 = vector.broadcast %173 : vector<1x256xf32> to vector<8x256xf32>
    %175 = arith.addf %172, %174 : vector<8x256xf32>
    %176 = arith.negf %175 : vector<8x256xf32>
    %177 = math.exp %176 : vector<8x256xf32>
    %cst_60 = arith.constant 1.000000e+00 : f32
    %178 = vector.broadcast %cst_60 : f32 to vector<8x256xf32>
    %179 = arith.addf %178, %177 : vector<8x256xf32>
    %180 = arith.divf %178, %179 : vector<8x256xf32>
    %c0_61 = arith.constant 0 : index
    %c0_62 = arith.constant 0 : index
    %181 = vector.load %arg6[%c0_61, %c0_62] : memref<256x128xf32, #tpu.memory_space<vmem>>, vector<256x128xf32>
    %cst_63 = arith.constant dense<0.000000e+00> : vector<8x128xf32>
    %182 = tpu.matmul %180, %181, %cst_63 {dimension_numbers = #tpu.dot_dimension_numbers<[1], [0], [0], [1], [0, 0, 1, 1], [], []>} : vector<8x256xf32>, vector<256x128xf32>, vector<8x128xf32> -> vector<8x128xf32>
    %c0_64 = arith.constant 0 : index
    %c0_65 = arith.constant 0 : index
    %183 = vector.load %arg7[%c0_64, %c0_65] : memref<1x128xf32, #tpu.memory_space<vmem>>, vector<1x128xf32>
    %184 = vector.broadcast %183 : vector<1x128xf32> to vector<8x128xf32>
    %185 = arith.addf %182, %184 : vector<8x128xf32>
    %cst_66 = arith.constant dense<0xFF800000> : vector<8xf32>
    %186 = vector.multi_reduction <maximumf>, %185, %cst_66 [1] : vector<8x128xf32> to vector<8xf32>
    %187 = vector.shape_cast %186 : vector<8xf32> to vector<8x1xf32>
    %188 = vector.broadcast %187 : vector<8x1xf32> to vector<8x128xf32>
    %189 = arith.subf %185, %188 : vector<8x128xf32>
    %190 = math.exp %189 : vector<8x128xf32>
    %cst_67 = arith.constant dense<0.000000e+00> : vector<8xf32>
    %191 = vector.multi_reduction <add>, %190, %cst_67 [1] : vector<8x128xf32> to vector<8xf32>
    %192 = vector.shape_cast %191 : vector<8xf32> to vector<8x1xf32>
    %193 = tpu.reciprocal %192 {approx = true} : vector<8x1xf32> -> vector<8x1xf32>
    %194 = arith.mulf %192, %193 : vector<8x1xf32>
    %cst_68 = arith.constant 2.000000e+00 : f32
    %195 = vector.broadcast %cst_68 : f32 to vector<8x1xf32>
    %196 = arith.subf %195, %194 : vector<8x1xf32>
    %197 = arith.mulf %193, %196 : vector<8x1xf32>
    %198 = vector.broadcast %197 : vector<8x1xf32> to vector<8x128xf32>
    %199 = arith.mulf %190, %198 : vector<8x128xf32>
    %c0_69 = arith.constant 0 : index
    %c0_70 = arith.constant 0 : index
    %200 = vector.load %arg8[%c0_69, %c0_70] : memref<8x128xf32, #tpu.memory_space<vmem>>, vector<8x128xf32>
    tpu.vector_store %arg8[%c0_69, %c0_70], %199 {strides = array<i32>} : memref<8x128xf32, #tpu.memory_space<vmem>>, vector<8x128xf32>,
    return
  }
}

</mosaic_0001>

<bundles_post_ra>
// kernel: surname_lstm_forward.1
= control target key start
LH: loop header
LB: loop body
LE: loop exit
PB: predicated region body
PF: predicated region fallthrough
CT: control target
= control target key end

     0   :  { %13 = vsyncpa [#allocation4], 0  ;;  %s1973_s0 = inlined_call_operand.vmem [shape: s32[64,1], index: 0, kind: input, shape index: {}]   ;;  %s1974_s1 = inlined_call_operand.hbm [shape: f32[128,128], index: 1, kind: input, shape index: {}]   ;;  %s1975_s2 = inlined_call_operand.vmem [shape: bf16[128,128], index: 2, kind: input, shape index: {}]   ;;  %s1976_s3 = inlined_call_operand.vmem [shape: f32[1,128], index: 3, kind: input, shape index: {}]   ;;  %s1977_s4 = inlined_call_operand.hbm [shape: f32[128,256], index: 4, kind: input, shape index: {}]   ;;  %s1978_s5 = inlined_call_operand.vmem [shape: f32[1,256], index: 5, kind: input, shape index: {}]   ;;  %s1979_s6 = inlined_call_operand.hbm [shape: f32[256,128], index: 6, kind: input, shape index: {}]   ;;  %s1980_s7 = inlined_call_operand.vmem [shape: f32[1,128], index: 7, kind: input, shape index: {}]   ;;  %s1981_s8 = inlined_call_operand.vmem [shape: f32[8,128], index: 8, kind: output, shape index: {}]  }
   0x1   :  { %14 = vsyncpa [#allocation6], 0  ;;  %s1586_s27 = smov [#allocation5]  }
   0x2   :  { %s38_s28 = sshll.u32 %s1586_s27, 4  ;;  %s39_s28 = int_to_ptr.vmem [resolvable:$true] %s38_s28 }
   0x3   :  { %s1530_s29 = scalar_lea.vmem %s39_s28, 4096  ;;  %p1535_p1 = scmp.lt.s32.totalorder %s39_s28, %s39_s28 }
   0x4   :  { %p1531_p0 = scmp.ne.s32.totalorder %s39_s28, %s1530_s29  ;;  %p1536_p2 = scmp.lt.s32.totalorder %s1530_s29, %s1530_s29 }
   0x6   :  { %p1537_p3 = por %p1536_p2, %p1535_p1 }
   0x8   :  { %p1538_p4 = pnand %p1537_p3, %p1531_p0 }
   0xa   :  { %1541 = shalt.err (!%p1538_p4)
}
   0xb   :  { %s1587_s30 = smov 256   ;;  %s1588_s9 = smov 16  }
   0xc   :  { %44 = dma.hbm_to_vmem [thread:$0]  %s1977_s4, 4096, %s39_s28, [#allocation6], %s1587_s30, %s1587_s30, %s1588_s9  }
   0xd   :  { %s1589_s12 = smov [#allocation3]  }
   0xe   :  { %s22_s13 = sshll.u32 %s1589_s12, 4  ;;  %s23_s13 = int_to_ptr.vmem [resolvable:$true] %s22_s13 }
   0xf   :  { %s1550_s14 = scalar_lea.vmem %s23_s13, 2048  ;;  %p1555_p6 = scmp.lt.s32.totalorder %s23_s13, %s23_s13 }
  0x10   :  { %p1551_p5 = scmp.ne.s32.totalorder %s23_s13, %s1550_s14  ;;  %p1556_p7 = scmp.lt.s32.totalorder %s1550_s14, %s1550_s14 }
  0x12   :  { %p1557_p8 = por %p1556_p7, %p1555_p6 }
  0x14   :  { %p1558_p9 = pnand %p1557_p8, %p1551_p5 }
  0x16   :  { %1561 = shalt.err (!%p1558_p9)
}
  0x17   :  { %s1590_s15 = smov 128   ;;  %s1591_s16 = smov 8  }
  0x18   :  { %28 = dma.hbm_to_vmem [thread:$0]  %s1974_s1, 2048, %s23_s13, [#allocation4], %s1590_s15, %s1590_s15, %s1591_s16  }
  0x19   :  { %s1592_s19 = smov [#allocation7]  }
  0x1a   :  { %s52_s20 = sshll.u32 %s1592_s19, 4  ;;  %s53_s20 = int_to_ptr.vmem [resolvable:$true] %s52_s20 }
  0x1b   :  { %s1570_s4 = scalar_lea.vmem %s53_s20, 4096  ;;  %p1575_p11 = scmp.lt.s32.totalorder %s53_s20, %s53_s20 }
  0x1c   :  { %p1571_p10 = scmp.ne.s32.totalorder %s53_s20, %s1570_s4  ;;  %p1576_p12 = scmp.lt.s32.totalorder %s1570_s4, %s1570_s4 }
  0x1e   :  { %p1577_p13 = por %p1576_p12, %p1575_p11 }
  0x20   :  { %p1578_p0 = pnand %p1577_p13, %p1571_p10 }
  0x22   :  { %1581 = shalt.err (!%p1578_p0)
}
  0x23   :  { %58 = dma.hbm_to_vmem [thread:$0]  %s1979_s6, 4096, %s53_s20, [#allocation6], %s1590_s15, %s1590_s15, %s1591_s16  }
  0x24   :  { %1582 = dma.done.wait [#allocation4], 2048  }
  0x25   :  { %1583 = vsyncadd [#allocation4], 4294965248 }
  0x26   :  { %1584 = dma.done.wait [#allocation6], 8192  }
  0x27   :  { %1585 = vsyncadd [#allocation6], 4294959104  ;;  %v1593_v0 = vmov 0   ;;  %v1594_v1 = vmov 0.0   ;;  %vm1595_vm0 = vmmov 0   ;;  %v73_v2 = vld [vmem:[%s1973_s0] sm:$0xff]  ;;  %v71_v31 = vlaneseq }
  0x28   :  { %1452 = vset.pattern.permute.xlu0 %v1593_v0  ;;  %1279 = vmatprep.subr.bf16.mxu1 %v1594_v1  ;;  %v74_v3 = vld [vmem:[%s1973_s0 + $0x8] sm:$0xff]  ;;  %v1667_v4 = vld [vmem:[%s1975_s2 + $0x38] sm:$0xff]   ;;  %v143_v6 = vld [vmem:[#allocation3 + $0x70] sm:$0xff]  ;;  %v1596_v34 = vmov 1.0   ;;  %s1598_s6 = smov 32  }
  0x29   :  { %1453 = vset.pattern.permute.xlu1 %v1593_v0  ;;  %1295 = vmatprep.mubr.msk.bf16.mxu1 %vm1595_vm0, %v1594_v1  ;;  %v144_v5 = vld [vmem:[#allocation3 + $0x78] sm:$0xff]  ;;  %v1673_v7 = vld [vmem:[%s1975_s2 + $0x30] sm:$0xff]   ;;  %v142_v8 = vld [vmem:[#allocation3 + $0x68] sm:$0xff]  ;;  %v1750_v32 = vand.u32 127, %v71_v31 }
  0x2a   :  { %82 = vperm.xlu0 %1452, %v73_v2   ;;  %1235 = vmatprep.subr.mxu0 %v144_v5  ;;  %v75_v9 = vld [vmem:[%s1973_s0 + $0x10] sm:$0xff]  ;;  %v141_v10 = vld [vmem:[#allocation3 + $0x60] sm:$0xff]  ;;  %v1682_v11 = vld [vmem:[%s1975_s2 + $0x28] sm:$0xff]  }
  0x2b   :  { %1280 = vmatpush3.bf16.msra.mxu1 %v1667_v4  ;;  %1236 = vmatpush3.msra.mxu0 %v144_v5  ;;  %v140_v12 = vld [vmem:[#allocation3 + $0x58] sm:$0xff]  ;;  %v77_v13 = vld [vmem:[%s1973_s0 + $0x20] sm:$0xff]  ;;  %v139_v14 = vld [vmem:[#allocation3 + $0x50] sm:$0xff]  ;;  %vm265_vm4 = vcmp.ge.s32.totalorder %v1750_v32, 64  ;;  %vm266_vm5 = vcmp.lt.s32.totalorder %v1750_v32, 96 }
  0x2c   :  { %1237 = vmatprep.subr.mxu0 %v143_v6  ;;  %1281 = vmatprep.subr.bf16.mxu1 %v1594_v1  ;;  %v1693_v15 = vld [vmem:[%s1975_s2 + $0x20] sm:$0xff]   ;;  %v138_v16 = vld [vmem:[#allocation3 + $0x48] sm:$0xff]  ;;  %v79_v17 = vld [vmem:[%s1973_s0 + $0x30] sm:$0xff] }
  0x2d   :  { %1238 = vmatpush3.msra.mxu0 %v143_v6  ;;  %v137_v18 = vld [vmem:[#allocation3 + $0x40] sm:$0xff]  ;;  %v1703_v19 = vld [vmem:[%s1975_s2 + $0x18] sm:$0xff]   ;;  %v135_v21 = vld [vmem:[#allocation3 + $0x30] sm:$0xff] }
  0x2e   :  { %85 = vperm.xlu0 %1452, %v74_v3   ;;  %1239 = vmatprep.subr.mxu0 %v142_v8  ;;  %v136_v20 = vld [vmem:[#allocation3 + $0x38] sm:$0xff]  ;;  %v1710_v22 = vld [vmem:[%s1975_s2 + $0x10] sm:$0xff]   ;;  %v134_v23 = vld [vmem:[#allocation3 + $0x28] sm:$0xff] }
  0x2f   :  { %1282 = vmatpush3.bf16.msra.mxu1 %v1673_v7  ;;  %1240 = vmatpush3.msra.mxu0 %v142_v8  ;;  %v133_v24 = vld [vmem:[#allocation3 + $0x20] sm:$0xff]  ;;  %v1717_v25 = vld [vmem:[%s1975_s2 + $0x8] sm:$0xff]   ;;  %v132_v26 = vld [vmem:[#allocation3 + $0x18] sm:$0xff] }
  0x30   :  { %1241 = vmatprep.subr.mxu0 %v141_v10  ;;  %1283 = vmatprep.subr.bf16.mxu1 %v1594_v1  ;;  %v131_v27 = vld [vmem:[#allocation3 + $0x10] sm:$0xff]  ;;  %v1724_v28 = vld [vmem:[%s1975_s2] sm:$0xff]   ;;  %v130_v29 = vld [vmem:[#allocation3 + $0x8] sm:$0xff] }
  0x31   :  { %1242 = vmatpush3.msra.mxu0 %v141_v10  ;;  %v129_v30 = vld [vmem:[#allocation3] sm:$0xff]  ;;  %vm267_vm6 = vmand %vm265_vm4, %vm266_vm5  ;;  %v76_v56 = vld [vmem:[%s1973_s0 + $0x18] sm:$0xff] }
  0x32   :  { %88 = vperm.xlu0 %1452, %v75_v9   ;;  %1243 = vmatprep.subr.mxu0 %v140_v12  ;;  %v1779_v42 = vld [vmem:[%s1976_s3] ss:$0 sm:$0xff]  ;;  %v1785_v49 = vsel %vm267_vm6, 2.0, %v1596_v34  ;;  %v1788_v51 = vsel %vm267_vm6, -1.0, %v1594_v1  ;;  %s1597_s3 = smov 64   ;;  %v78_v57 = vld [vmem:[%s1973_s0 + $0x28] sm:$0xff] }
  0x33   :  { %1284 = vmatpush3.bf16.msra.mxu1 %v1682_v11  ;;  %1244 = vmatpush3.msra.mxu0 %v140_v12  ;;  %v80_v58 = vld [vmem:[%s1973_s0 + $0x38] sm:$0xff] }
  0x34   :  { %1245 = vmatprep.subr.mxu0 %v139_v14  ;;  %1285 = vmatprep.subr.bf16.mxu1 %v1594_v1 }
  0x35   :  { %1246 = vmatpush3.msra.mxu0 %v139_v14 }
  0x36   :  { %94 = vperm.xlu0 %1452, %v77_v13   ;;  %1247 = vmatprep.subr.mxu0 %v138_v16 }
  0x37   :  { %1286 = vmatpush3.bf16.msra.mxu1 %v1693_v15  ;;  %1248 = vmatpush3.msra.mxu0 %v138_v16 }
  0x38   :  { %1249 = vmatprep.subr.mxu0 %v137_v18  ;;  %1287 = vmatprep.subr.bf16.mxu1 %v1594_v1 }
  0x39   :  { %1250 = vmatpush3.msra.mxu0 %v137_v18 }
  0x3a   :  { %100 = vperm.xlu0 %1452, %v79_v17   ;;  %1251 = vmatprep.subr.mxu0 %v136_v20 }
  0x3b   :  { %1288 = vmatpush3.bf16.msra.mxu1 %v1703_v19  ;;  %1252 = vmatpush3.msra.mxu0 %v136_v20 }
  0x3c   :  { %1253 = vmatprep.subr.mxu0 %v135_v21  ;;  %1289 = vmatprep.subr.bf16.mxu1 %v1594_v1 }
  0x3d   :  { %1254 = vmatpush3.msra.mxu0 %v135_v21 }
  0x3e   :  { %1255 = vmatprep.subr.mxu0 %v134_v23 }
  0x3f   :  { %1290 = vmatpush3.bf16.msra.mxu1 %v1710_v22  ;;  %1256 = vmatpush3.msra.mxu0 %v134_v23 }
  0x40   :  { %1257 = vmatprep.subr.mxu0 %v133_v24  ;;  %1291 = vmatprep.subr.bf16.mxu1 %v1594_v1 }
  0x41   :  { %1258 = vmatpush3.msra.mxu0 %v133_v24 }
  0x42   :  { %1259 = vmatprep.subr.mxu0 %v132_v26 }
  0x43   :  { %1292 = vmatpush3.bf16.msra.mxu1 %v1717_v25  ;;  %1260 = vmatpush3.msra.mxu0 %v132_v26 }
  0x44   :  { %1261 = vmatprep.subr.mxu0 %v131_v27  ;;  %1293 = vmatprep.subr.bf16.mxu1 %v1594_v1 }
  0x45   :  { %1262 = vmatpush3.msra.mxu0 %v131_v27 }
  0x46   :  { %1263 = vmatprep.subr.mxu0 %v130_v29 }
  0x47   :  { %1294 = vmatpush3.bf16.msra.mxu1 %v1724_v28  ;;  %1264 = vmatpush3.msra.mxu0 %v130_v29 }
  0x48   :  { %1265 = vmatprep.subr.mxu0 %v129_v30  ;;  %1319 = vmatprep.subr.bf16.mxu1 %v1594_v1 }
  0x49   :  { %1266 = vmatpush3.msra.mxu0 %v129_v30 }
  0x4a   :  { %1296 = vmatmul.mubr.bf16.vlgmr.msra.gmra.mxu1 %v1593_v0  ;;  %1299 = vmatprep.subr.bf16.mxu0 %v1594_v1 }
  0x4b   :  { %1320 = vmatpush3.bf16.msra.mxu1 %v1667_v4  ;;  %1335 = vmatprep.mubr.msk.bf16.mxu1 %vm1595_vm0, %v1594_v1 }
  0x4c   :  { %1321 = vmatprep.subr.bf16.mxu1 %v1594_v1 }
  0x4f   :  { %1322 = vmatpush3.bf16.msra.mxu1 %v1673_v7 }
  0x50   :  { %1323 = vmatprep.subr.bf16.mxu1 %v1594_v1 }
  0x53   :  { %1324 = vmatpush3.bf16.msra.mxu1 %v1682_v11 }
  0x54   :  { %1325 = vmatprep.subr.bf16.mxu1 %v1594_v1 }
  0x57   :  { %1326 = vmatpush3.bf16.msra.mxu1 %v1693_v15 }
  0x58   :  { %1327 = vmatprep.subr.bf16.mxu1 %v1594_v1 }
  0x5b   :  { %1328 = vmatpush3.bf16.msra.mxu1 %v1703_v19 }
  0x5c   :  { %1329 = vmatprep.subr.bf16.mxu1 %v1594_v1 }
  0x5f   :  { %1330 = vmatpush3.bf16.msra.mxu1 %v1710_v22 }
  0x60   :  { %1331 = vmatprep.subr.bf16.mxu1 %v1594_v1 }
  0x63   :  { %1332 = vmatpush3.bf16.msra.mxu1 %v1717_v25 }
  0x64   :  { %1333 = vmatprep.subr.bf16.mxu1 %v1594_v1 }
  0x67   :  { %1334 = vmatpush3.bf16.msra.mxu1 %v1724_v28 }
  0x68   :  { %1359 = vmatprep.subr.bf16.mxu1 %v1594_v1 }
  0xa5   :  { %v83_v33 = vpop.permute.xlu0 %82 }
  0xa6   :  { %vm105_vm1 = vcmp.eq.s32.totalorder %v1750_v32, %v83_v33 }
  0xa7   :  { %1267 = vmatprep.mubr.msk.f32.mxu0 %vm105_vm1, %v1596_v34 }
  0xa9   :  { %v86_v35 = vpop.permute.xlu0 %85 }
  0xaa   :  { %vm106_vm2 = vcmp.eq.s32.totalorder %v1750_v32, %v86_v35 }
  0xab   :  { %1268 = vmatmul.mubr.msk.f32.vlgmr.msra.gmra.mxu0 %vm106_vm2, %v1596_v34 }
  0xac   :  { %1300 = vmatpush3.bf16.msra.mxu0 %v1667_v4 }
  0xad   :  { %v89_v36 = vpop.permute.xlu0 %88  ;;  %1301 = vmatprep.subr.bf16.mxu0 %v1594_v1 }
  0xae   :  { %vm107_vm3 = vcmp.eq.s32.totalorder %v1750_v32, %v89_v36 }
  0xaf   :  { %1270 = vmatprep.mubr.msk.f32.mxu0 %vm107_vm3, %v1596_v34 }
  0xb0   :  { %1302 = vmatpush3.bf16.msra.mxu0 %v1673_v7 }
  0xb1   :  { %1303 = vmatprep.subr.bf16.mxu0 %v1594_v1  ;;  %v95_v62 = vpop.permute.xlu0 %94 }
  0xb2   :  { %vm109_vm8 = vcmp.eq.s32.totalorder %v1750_v32, %v95_v62 }
  0xb4   :  { %1304 = vmatpush3.bf16.msra.mxu0 %v1682_v11 }
  0xb5   :  { %1305 = vmatprep.subr.bf16.mxu0 %v1594_v1  ;;  %v101_v0 = vpop.permute.xlu0 %100 }
  0xb6   :  { %vm111_vm10 = vcmp.eq.s32.totalorder %v1750_v32, %v101_v0 }
  0xb8   :  { %1306 = vmatpush3.bf16.msra.mxu0 %v1693_v15 }
  0xb9   :  { %1307 = vmatprep.subr.bf16.mxu0 %v1594_v1 }
  0xbc   :  { %1308 = vmatpush3.bf16.msra.mxu0 %v1703_v19 }
  0xbd   :  { %1309 = vmatprep.subr.bf16.mxu0 %v1594_v1 }
  0xc0   :  { %1310 = vmatpush3.bf16.msra.mxu0 %v1710_v22 }
  0xc1   :  { %1311 = vmatprep.subr.bf16.mxu0 %v1594_v1 }
  0xc4   :  { %1312 = vmatpush3.bf16.msra.mxu0 %v1717_v25 }
  0xc5   :  { %1313 = vmatprep.subr.bf16.mxu0 %v1594_v1 }
  0xc8   :  { %1314 = vmatpush3.bf16.msra.mxu0 %v1724_v28 }
  0xc9   :  { %1339 = vmatprep.subr.bf16.mxu0 %v1594_v1 }
 0x10a   :  { %v369_v37 = vpop.f32.mrf.mxu1 }
 0x10c   :  { %v1297_v38 = vpop.f32.mrf.mxu1 }
 0x10e   :  { %v372_v39 = vpop.f32.mrf.mxu1 }
 0x110   :  { %v1298_v40 = vpop.f32.mrf.mxu1 }
 0x16b   :  { %v1774_v41 = vpop.f32.mrf.mxu0 }
 0x16c   :  { %v224_v17 = vadd.f32 %v1774_v41, %v1779_v42 }
 0x16d   :  { %v218_v43 = vpop.f32.mrf.mxu0 }
 0x16e   :  { %v219_v44 = vadd.f32 %v1779_v42, %v218_v43 }
 0x170   :  { %v375_v45 = vadd.f32 %v369_v37, %v219_v44 }
 0x172   :  { %v1093_v46 = vmul.f32 -1.442695, %v375_v45 }
 0x174   :  { %1462 = vpow2.f32 %v1093_v46 }
 0x181   :  { %v1463_v47 = vpop.eup %1462 }
 0x182   :  { %v379_v48 = vadd.f32 1.0, %v1463_v47 }
 0x184   :  { %1464 = vrcp.f32 %v379_v48 }
 0x191   :  { %v1465_v50 = vpop.eup %1464 }
 0x192   :  { %v382_v52 = vmul.f32 %v1465_v50, %v1785_v49 }
 0x194   :  { %v383_v53 = vadd.f32 %v382_v52, %v1788_v51 }
 0x196   :  { %384 = vrot.lane.b32.xlu1 %v383_v53, %s1597_s3  ;;  %v389_v59 = vmul.f32 0.0, %v383_v53 }
 0x208   :  { %v385_v54 = vpop.permute.xlu1 %384 }
 0x209   :  { %v386_v55 = vmul.f32 %v385_v54, %v383_v53 }
 0x20b   :  { %387 = vrot.lane.b32.xlu1 %v386_v55, %s1598_s6 }
 0x20f   :  { %91 = vperm.xlu1 %1453, %v76_v56  }
 0x213   :  { %97 = vperm.xlu1 %1453, %v78_v57  }
 0x217   :  { %103 = vperm.xlu1 %1453, %v80_v58  }
 0x27d   :  { %v388_v60 = vpop.permute.xlu1 %387 }
 0x27e   :  { %v1803_v61 = vadd.f32 %v389_v59, %v388_v60 }
 0x280   :  { %1466 = vtanh.f32 %v1803_v61 }
 0x28a   :  { %v92_v63 = vpop.permute.xlu1 %91 }
 0x28b   :  { %vm108_vm7 = vcmp.eq.s32.totalorder %v1750_v32, %v92_v63 }
 0x28c   :  { %1271 = vmatmul.mubr.msk.f32.gmra.mxu0 %vm108_vm7, %v1596_v34 }
 0x28d   :  { %1273 = vmatprep.mubr.msk.f32.mxu0 %vm109_vm8, %v1596_v34  ;;  %v1467_v3 = vpop.eup %1466 }
 0x28e   :  { %v98_v2 = vpop.permute.xlu1 %97  ;;  %v392_v6 = vmul.f32 %v1467_v3, %v385_v54 }
 0x28f   :  { %vm110_vm9 = vcmp.eq.s32.totalorder %v1750_v32, %v98_v2 }
 0x290   :  { %1274 = vmatmul.mubr.msk.f32.gmra.mxu0 %vm110_vm9, %v1596_v34  ;;  %v394_v8 = vpack.c.bf16 %v392_v6, %v392_v6 }
 0x291   :  { %1276 = vmatprep.mubr.msk.f32.mxu0 %vm111_vm10, %v1596_v34 }
 0x292   :  { %v104_v5 = vpop.permute.xlu1 %103 }
 0x293   :  { %vm112_vm11 = vcmp.eq.s32.totalorder %v1750_v32, %v104_v5 }
 0x294   :  { %1277 = vmatmul.mubr.msk.f32.gmra.mxu0 %vm112_vm11, %v1596_v34 }
 0x295   :  { %1315 = vmatprep.mubr.msk.bf16.mxu0 %vm1595_vm0, %v1594_v1 }
 0x298   :  { %1316 = vmatmul.mubr.bf16.vlgmr.msra.gmra.mxu0 %v394_v8 }
 0x299   :  { %1340 = vmatpush3.bf16.msra.mxu0 %v1667_v4  ;;  %1355 = vmatprep.mubr.msk.bf16.mxu0 %vm1595_vm0, %v1594_v1 }
 0x29a   :  { %1341 = vmatprep.subr.bf16.mxu0 %v1594_v1 }
 0x29d   :  { %1342 = vmatpush3.bf16.msra.mxu0 %v1673_v7 }
 0x29e   :  { %1343 = vmatprep.subr.bf16.mxu0 %v1594_v1 }
 0x2a1   :  { %1344 = vmatpush3.bf16.msra.mxu0 %v1682_v11 }
 0x2a2   :  { %1345 = vmatprep.subr.bf16.mxu0 %v1594_v1 }
 0x2a5   :  { %1346 = vmatpush3.bf16.msra.mxu0 %v1693_v15 }
 0x2a6   :  { %1347 = vmatprep.subr.bf16.mxu0 %v1594_v1 }
 0x2a9   :  { %1348 = vmatpush3.bf16.msra.mxu0 %v1703_v19 }
 0x2aa   :  { %1349 = vmatprep.subr.bf16.mxu0 %v1594_v1 }
 0x2ad   :  { %1350 = vmatpush3.bf16.msra.mxu0 %v1710_v22 }
 0x2ae   :  { %1351 = vmatprep.subr.bf16.mxu0 %v1594_v1 }
 0x2b1   :  { %1352 = vmatpush3.bf16.msra.mxu0 %v1717_v25 }
 0x2b2   :  { %1353 = vmatprep.subr.bf16.mxu0 %v1594_v1 }
 0x2b5   :  { %1354 = vmatpush3.bf16.msra.mxu0 %v1724_v28 }
 0x2b6   :  { %1379 = vmatprep.subr.bf16.mxu0 %v1594_v1 }
 0x34c   :  { %v1836_v9 = vpop.f32.mrf.mxu0 }
 0x34d   :  { %v234_v2 = vadd.f32 %v1836_v9, %v1779_v42 }
 0x34e   :  { %v228_v10 = vpop.f32.mrf.mxu0 }
 0x34f   :  { %v229_v43 = vadd.f32 %v1779_v42, %v228_v10 }
 0x350   :  { %v1838_v12 = vpop.f32.mrf.mxu0 }
 0x352   :  { %v1840_v13 = vpop.f32.mrf.mxu0 }
 0x354   :  { %v1842_v14 = vpop.f32.mrf.mxu0 }
 0x356   :  { %v1844_v16 = vpop.f32.mrf.mxu0 }
 0x358   :  { %v429_v18 = vpop.f32.mrf.mxu0 }
 0x359   :  { %v435_v20 = vadd.f32 %v429_v18, %v224_v17 }
 0x35a   :  { %v1317_v21 = vpop.f32.mrf.mxu0 }
 0x35b   :  { %v1094_v23 = vmul.f32 -1.442695, %v435_v20 }
 0x35c   :  { %v432_v24 = vpop.f32.mrf.mxu0 }
 0x35d   :  { %1468 = vpow2.f32 %v1094_v23 }
 0x35e   :  { %v1318_v26 = vpop.f32.mrf.mxu0 }
 0x36a   :  { %v1469_v27 = vpop.eup %1468 }
 0x36b   :  { %v439_v29 = vadd.f32 1.0, %v1469_v27 }
 0x36d   :  { %1470 = vrcp.f32 %v439_v29 }
 0x37a   :  { %v1471_v30 = vpop.eup %1470 }
 0x37b   :  { %v442_v32 = vmul.f32 %v1471_v30, %v1785_v49 }
 0x37d   :  { %v443_v33 = vadd.f32 %v442_v32, %v1788_v51 }
 0x37f   :  { %444 = vrot.lane.b32.xlu0 %v443_v33, %s1597_s3  ;;  %v449_v36 = vmul.f32 %v443_v33, %v1803_v61 }
 0x3f1   :  { %v445_v34 = vpop.permute.xlu0 %444 }
 0x3f2   :  { %v446_v35 = vmul.f32 %v445_v34, %v443_v33 }
 0x3f4   :  { %447 = vrot.lane.b32.xlu1 %v446_v35, %s1598_s6  ;;  %v239_v35 = vadd.f32 %v1779_v42, %v1840_v13 }
 0x466   :  { %v448_v37 = vpop.permute.xlu1 %447 }
 0x467   :  { %v450_v38 = vadd.f32 %v449_v36, %v448_v37 }
 0x469   :  { %1472 = vtanh.f32 %v450_v38 }
 0x476   :  { %v1473_v39 = vpop.eup %1472 }
 0x477   :  { %v452_v40 = vmul.f32 %v1473_v39, %v445_v34 }
 0x479   :  { %v454_v41 = vpack.c.bf16 %v452_v40, %v452_v40 }
 0x47b   :  { %1336 = vmatmul.mubr.bf16.vlgmr.msra.gmra.mxu1 %v454_v41 }
 0x47c   :  { %1360 = vmatpush3.bf16.msra.mxu1 %v1667_v4  ;;  %1375 = vmatprep.mubr.msk.bf16.mxu1 %vm1595_vm0, %v1594_v1 }
 0x47d   :  { %1361 = vmatprep.subr.bf16.mxu1 %v1594_v1 }
 0x480   :  { %1362 = vmatpush3.bf16.msra.mxu1 %v1673_v7 }
 0x481   :  { %1363 = vmatprep.subr.bf16.mxu1 %v1594_v1 }
 0x484   :  { %1364 = vmatpush3.bf16.msra.mxu1 %v1682_v11 }
 0x485   :  { %1365 = vmatprep.subr.bf16.mxu1 %v1594_v1 }
 0x488   :  { %1366 = vmatpush3.bf16.msra.mxu1 %v1693_v15 }
 0x489   :  { %1367 = vmatprep.subr.bf16.mxu1 %v1594_v1 }
 0x48c   :  { %1368 = vmatpush3.bf16.msra.mxu1 %v1703_v19 }
 0x48d   :  { %1369 = vmatprep.subr.bf16.mxu1 %v1594_v1 }
 0x490   :  { %1370 = vmatpush3.bf16.msra.mxu1 %v1710_v22 }
 0x491   :  { %1371 = vmatprep.subr.bf16.mxu1 %v1594_v1 }
 0x494   :  { %1372 = vmatpush3.bf16.msra.mxu1 %v1717_v25 }
 0x495   :  { %1373 = vmatprep.subr.bf16.mxu1 %v1594_v1 }
 0x498   :  { %1374 = vmatpush3.bf16.msra.mxu1 %v1724_v28 }
 0x499   :  { %1399 = vmatprep.subr.bf16.mxu1 %v1594_v1 }
 0x53b   :  { %v489_v44 = vpop.f32.mrf.mxu1 }
 0x53c   :  { %v495_v45 = vadd.f32 %v489_v44, %v229_v43 }
 0x53d   :  { %v1337_v46 = vpop.f32.mrf.mxu1 }
 0x53e   :  { %v1095_v47 = vmul.f32 -1.442695, %v495_v45 }
 0x53f   :  { %v492_v48 = vpop.f32.mrf.mxu1 }
 0x540   :  { %1474 = vpow2.f32 %v1095_v47 }
 0x541   :  { %v1338_v50 = vpop.f32.mrf.mxu1 }
 0x54d   :  { %v1475_v52 = vpop.eup %1474 }
 0x54e   :  { %v499_v53 = vadd.f32 1.0, %v1475_v52 }
 0x550   :  { %1476 = vrcp.f32 %v499_v53 }
 0x55d   :  { %v1477_v54 = vpop.eup %1476 }
 0x55e   :  { %v502_v55 = vmul.f32 %v1477_v54, %v1785_v49 }
 0x560   :  { %v503_v56 = vadd.f32 %v502_v55, %v1788_v51 }
 0x562   :  { %504 = vrot.lane.b32.xlu0 %v503_v56, %s1597_s3  ;;  %v509_v59 = vmul.f32 %v503_v56, %v450_v38 }
 0x5d4   :  { %v505_v57 = vpop.permute.xlu0 %504 }
 0x5d5   :  { %v506_v58 = vmul.f32 %v505_v57, %v503_v56 }
 0x5d7   :  { %507 = vrot.lane.b32.xlu1 %v506_v58, %s1598_s6 }
 0x649   :  { %v508_v60 = vpop.permute.xlu1 %507 }
 0x64a   :  { %v510_v61 = vadd.f32 %v509_v59, %v508_v60 }
 0x64c   :  { %1478 = vtanh.f32 %v510_v61 }
 0x659   :  { %v1479_v62 = vpop.eup %1478 }
 0x65a   :  { %v512_v63 = vmul.f32 %v1479_v62, %v505_v57 }
 0x65c   :  { %v514_v0 = vpack.c.bf16 %v512_v63, %v512_v63 }
 0x65e   :  { %1356 = vmatmul.mubr.bf16.vlgmr.msra.gmra.mxu0 %v514_v0 }
 0x65f   :  { %1380 = vmatpush3.bf16.msra.mxu0 %v1667_v4  ;;  %1395 = vmatprep.mubr.msk.bf16.mxu0 %vm1595_vm0, %v1594_v1 }
 0x660   :  { %1381 = vmatprep.subr.bf16.mxu0 %v1594_v1 }
 0x663   :  { %1382 = vmatpush3.bf16.msra.mxu0 %v1673_v7 }
 0x664   :  { %1383 = vmatprep.subr.bf16.mxu0 %v1594_v1 }
 0x667   :  { %1384 = vmatpush3.bf16.msra.mxu0 %v1682_v11 }
 0x668   :  { %1385 = vmatprep.subr.bf16.mxu0 %v1594_v1 }
 0x66b   :  { %1386 = vmatpush3.bf16.msra.mxu0 %v1693_v15 }
 0x66c   :  { %1387 = vmatprep.subr.bf16.mxu0 %v1594_v1 }
 0x66f   :  { %1388 = vmatpush3.bf16.msra.mxu0 %v1703_v19 }
 0x670   :  { %1389 = vmatprep.subr.bf16.mxu0 %v1594_v1 }
 0x673   :  { %1390 = vmatpush3.bf16.msra.mxu0 %v1710_v22 }
 0x674   :  { %1391 = vmatprep.subr.bf16.mxu0 %v1594_v1 }
 0x677   :  { %1392 = vmatpush3.bf16.msra.mxu0 %v1717_v25 }
 0x678   :  { %1393 = vmatprep.subr.bf16.mxu0 %v1594_v1 }
 0x67b   :  { %1394 = vmatpush3.bf16.msra.mxu0 %v1724_v28 }
 0x67c   :  { %1419 = vmatprep.subr.bf16.mxu0 %v1594_v1 }
 0x71e   :  { %v549_v3 = vpop.f32.mrf.mxu0 }
 0x71f   :  { %v555_v5 = vadd.f32 %v549_v3, %v234_v2 }
 0x720   :  { %v1357_v6 = vpop.f32.mrf.mxu0 }
 0x721   :  { %v1096_v8 = vmul.f32 -1.442695, %v555_v5  ;;  %v249_v6 = vadd.f32 %v1779_v42, %v1844_v16 }
 0x722   :  { %v552_v10 = vpop.f32.mrf.mxu0 }
 0x723   :  { %1480 = vpow2.f32 %v1096_v8 }
 0x724   :  { %v1358_v17 = vpop.f32.mrf.mxu0 }
 0x730   :  { %v1481_v18 = vpop.eup %1480 }
 0x731   :  { %v559_v20 = vadd.f32 1.0, %v1481_v18 }
 0x733   :  { %1482 = vrcp.f32 %v559_v20 }
 0x740   :  { %v1483_v21 = vpop.eup %1482 }
 0x741   :  { %v562_v23 = vmul.f32 %v1483_v21, %v1785_v49 }
 0x743   :  { %v563_v24 = vadd.f32 %v562_v23, %v1788_v51 }
 0x745   :  { %564 = vrot.lane.b32.xlu0 %v563_v24, %s1597_s3  ;;  %v569_v9 = vmul.f32 %v563_v24, %v510_v61 }
 0x7b7   :  { %v565_v26 = vpop.permute.xlu0 %564 }
 0x7b8   :  { %v566_v27 = vmul.f32 %v565_v26, %v563_v24 }
 0x7ba   :  { %567 = vrot.lane.b32.xlu1 %v566_v27, %s1598_s6 }
 0x82c   :  { %v568_v29 = vpop.permute.xlu1 %567 }
 0x82d   :  { %v570_v30 = vadd.f32 %v569_v9, %v568_v29 }
 0x82f   :  { %1484 = vtanh.f32 %v570_v30 }
 0x83c   :  { %v1485_v32 = vpop.eup %1484 }
 0x83d   :  { %v572_v33 = vmul.f32 %v1485_v32, %v565_v26 }
 0x83f   :  { %v574_v34 = vpack.c.bf16 %v572_v33, %v572_v33 }
 0x841   :  { %1376 = vmatmul.mubr.bf16.vlgmr.msra.gmra.mxu1 %v574_v34 }
 0x842   :  { %1400 = vmatpush3.bf16.msra.mxu1 %v1667_v4  ;;  %1415 = vmatprep.mubr.msk.bf16.mxu1 %vm1595_vm0, %v1594_v1 }
 0x843   :  { %1401 = vmatprep.subr.bf16.mxu1 %v1594_v1 }
 0x846   :  { %1402 = vmatpush3.bf16.msra.mxu1 %v1673_v7 }
 0x847   :  { %1403 = vmatprep.subr.bf16.mxu1 %v1594_v1 }
 0x84a   :  { %1404 = vmatpush3.bf16.msra.mxu1 %v1682_v11 }
 0x84b   :  { %1405 = vmatprep.subr.bf16.mxu1 %v1594_v1 }
 0x84e   :  { %1406 = vmatpush3.bf16.msra.mxu1 %v1693_v15 }
 0x84f   :  { %1407 = vmatprep.subr.bf16.mxu1 %v1594_v1 }
 0x852   :  { %1408 = vmatpush3.bf16.msra.mxu1 %v1703_v19 }
 0x853   :  { %1409 = vmatprep.subr.bf16.mxu1 %v1594_v1 }
 0x856   :  { %1410 = vmatpush3.bf16.msra.mxu1 %v1710_v22 }
 0x857   :  { %1411 = vmatprep.subr.bf16.mxu1 %v1594_v1 }
 0x85a   :  { %1412 = vmatpush3.bf16.msra.mxu1 %v1717_v25 }
 0x85b   :  { %1413 = vmatprep.subr.bf16.mxu1 %v1594_v1 }
 0x85e   :  { %1414 = vmatpush3.bf16.msra.mxu1 %v1724_v28 }
 0x901   :  { %v609_v36 = vpop.f32.mrf.mxu1 }
 0x902   :  { %v615_v37 = vadd.f32 %v609_v36, %v239_v35  ;;  %v254_v36 = vadd.f32 %v1842_v14, %v1779_v42  ;;  %v837_v14 = vld [vmem:[#allocation5 + $0xc0] sm:$0xff] }
 0x903   :  { %v1377_v38 = vpop.f32.mrf.mxu1 }
 0x904   :  { %v1097_v39 = vmul.f32 -1.442695, %v615_v37 }
 0x905   :  { %v612_v40 = vpop.f32.mrf.mxu1 }
 0x906   :  { %1486 = vpow2.f32 %v1097_v39 }
 0x907   :  { %v1378_v41 = vpop.f32.mrf.mxu1 }
 0x913   :  { %v1487_v43 = vpop.eup %1486 }
 0x914   :  { %v619_v44 = vadd.f32 1.0, %v1487_v43 }
 0x916   :  { %1488 = vrcp.f32 %v619_v44 }
 0x923   :  { %v1489_v45 = vpop.eup %1488 }
 0x924   :  { %v622_v46 = vmul.f32 %v1489_v45, %v1785_v49 }
 0x926   :  { %v623_v47 = vadd.f32 %v622_v46, %v1788_v51  ;;  %v844_v46 = vld [vmem:[#allocation5 + $0xf8] sm:$0xff] }
 0x927   :  { %857 = vmatprep.subr.mxu1 %v844_v46  ;;  %v945_v46 = vld [vmem:[#allocation7 + $0x28] sm:$0xff] }
 0x928   :  { %624 = vrot.lane.b32.xlu0 %v623_v47, %s1597_s3  ;;  %v629_v13 = vmul.f32 %v623_v47, %v570_v30 }
 0x99a   :  { %v625_v48 = vpop.permute.xlu0 %624 }
 0x99b   :  { %v626_v50 = vmul.f32 %v625_v48, %v623_v47  ;;  %v843_v47 = vld [vmem:[#allocation5 + $0xf0] sm:$0xff] }
 0x99d   :  { %627 = vrot.lane.b32.xlu1 %v626_v50, %s1598_s6  ;;  %v841_v50 = vld [vmem:[#allocation5 + $0xe0] sm:$0xff] }
 0xa0f   :  { %v628_v52 = vpop.permute.xlu1 %627 }
 0xa10   :  { %v630_v53 = vadd.f32 %v629_v13, %v628_v52  ;;  %v840_v13 = vld [vmem:[#allocation5 + $0xd8] sm:$0xff]  ;;  %v839_v52 = vld [vmem:[#allocation5 + $0xd0] sm:$0xff] }
 0xa12   :  { %1490 = vtanh.f32 %v630_v53 }
 0xa1f   :  { %v1491_v54 = vpop.eup %1490 }
 0xa20   :  { %v632_v55 = vmul.f32 %v1491_v54, %v625_v48  ;;  %v842_v48 = vld [vmem:[#allocation5 + $0xe8] sm:$0xff]  ;;  %v836_v54 = vld [vmem:[#allocation5 + $0xb8] sm:$0xff] }
 0xa22   :  { %v634_v56 = vpack.c.bf16 %v632_v55, %v632_v55 }
 0xa24   :  { %1396 = vmatmul.mubr.bf16.vlgmr.msra.gmra.mxu0 %v634_v56  ;;  %v835_v56 = vld [vmem:[#allocation5 + $0xb0] sm:$0xff] }
 0xa25   :  { %1420 = vmatpush3.bf16.msra.mxu0 %v1667_v4  ;;  %1435 = vmatprep.mubr.msk.bf16.mxu0 %vm1595_vm0, %v1594_v1  ;;  %v244_v4 = vadd.f32 %v1838_v12, %v1779_v42  ;;  %v838_v42 = vld [vmem:[#allocation5 + $0xc8] sm:$0xff] }
 0xa26   :  { %1421 = vmatprep.subr.bf16.mxu0 %v1594_v1 }
 0xa29   :  { %1422 = vmatpush3.bf16.msra.mxu0 %v1673_v7 }
 0xa2a   :  { %1423 = vmatprep.subr.bf16.mxu0 %v1594_v1 }
 0xa2d   :  { %1424 = vmatpush3.bf16.msra.mxu0 %v1682_v11 }
 0xa2e   :  { %1425 = vmatprep.subr.bf16.mxu0 %v1594_v1 }
 0xa31   :  { %1426 = vmatpush3.bf16.msra.mxu0 %v1693_v15 }
 0xa32   :  { %1427 = vmatprep.subr.bf16.mxu0 %v1594_v1 }
 0xa35   :  { %1428 = vmatpush3.bf16.msra.mxu0 %v1703_v19 }
 0xa36   :  { %1429 = vmatprep.subr.bf16.mxu0 %v1594_v1 }
 0xa39   :  { %1430 = vmatpush3.bf16.msra.mxu0 %v1710_v22 }
 0xa3a   :  { %1431 = vmatprep.subr.bf16.mxu0 %v1594_v1 }
 0xa3d   :  { %1432 = vmatpush3.bf16.msra.mxu0 %v1717_v25 }
 0xa3e   :  { %1433 = vmatprep.subr.bf16.mxu0 %v1594_v1 }
 0xa41   :  { %1434 = vmatpush3.bf16.msra.mxu0 %v1724_v28 }
 0xae4   :  { %v669_v7 = vpop.f32.mrf.mxu0 }
 0xae5   :  { %v675_v11 = vadd.f32 %v669_v7, %v244_v4  ;;  %v834_v4 = vld [vmem:[#allocation5 + $0xa8] sm:$0xff] }
 0xae6   :  { %v1397_v15 = vpop.f32.mrf.mxu0 }
 0xae7   :  { %v1098_v57 = vmul.f32 -1.442695, %v675_v11  ;;  %v833_v11 = vld [vmem:[#allocation5 + $0xa0] sm:$0xff]  ;;  %v832_v15 = vld [vmem:[#allocation5 + $0x98] sm:$0xff] }
 0xae8   :  { %v672_v19 = vpop.f32.mrf.mxu0 }
 0xae9   :  { %1492 = vpow2.f32 %v1098_v57  ;;  %v831_v57 = vld [vmem:[#allocation5 + $0x90] sm:$0xff]  ;;  %v830_v19 = vld [vmem:[#allocation5 + $0x88] sm:$0xff] }
 0xaea   :  { %v1398_v58 = vpop.f32.mrf.mxu0 }
 0xaeb   :  { %v828_v58 = vld [vmem:[#allocation5 + $0x78] sm:$0xff] }
 0xaf6   :  { %v1493_v59 = vpop.eup %1492 }
 0xaf7   :  { %v679_v22 = vadd.f32 1.0, %v1493_v59  ;;  %v827_v59 = vld [vmem:[#allocation5 + $0x70] sm:$0xff] }
 0xaf9   :  { %1494 = vrcp.f32 %v679_v22  ;;  %v826_v22 = vld [vmem:[#allocation5 + $0x68] sm:$0xff] }
 0xb06   :  { %v1495_v60 = vpop.eup %1494 }
 0xb07   :  { %v682_v25 = vmul.f32 %v1495_v60, %v1785_v49  ;;  %v824_v60 = vld [vmem:[#allocation5 + $0x58] sm:$0xff] }
 0xb09   :  { %v683_v61 = vadd.f32 %v682_v25, %v1788_v51  ;;  %v823_v25 = vld [vmem:[#allocation5 + $0x50] sm:$0xff] }
 0xb0b   :  { %684 = vrot.lane.b32.xlu0 %v683_v61, %s1597_s3  ;;  %v689_v12 = vmul.f32 %v683_v61, %v630_v53 }
 0xb7d   :  { %v685_v28 = vpop.permute.xlu0 %684 }
 0xb7e   :  { %v686_v62 = vmul.f32 %v685_v28, %v683_v61  ;;  %v822_v61 = vld [vmem:[#allocation5 + $0x48] sm:$0xff] }
 0xb80   :  { %687 = vrot.lane.b32.xlu1 %v686_v62, %s1598_s6  ;;  %v820_v62 = vld [vmem:[#allocation5 + $0x38] sm:$0xff] }
 0xbf2   :  { %v688_v63 = vpop.permute.xlu1 %687 }
 0xbf3   :  { %v690_v0 = vadd.f32 %v689_v12, %v688_v63  ;;  %v819_v12 = vld [vmem:[#allocation5 + $0x30] sm:$0xff]  ;;  %v818_v63 = vld [vmem:[#allocation5 + $0x28] sm:$0xff] }
 0xbf5   :  { %1496 = vtanh.f32 %v690_v0 }
 0xc02   :  { %v1497_v2 = vpop.eup %1496 }
 0xc03   :  { %v692_v3 = vmul.f32 %v1497_v2, %v685_v28  ;;  %v821_v28 = vld [vmem:[#allocation5 + $0x40] sm:$0xff] }
 0xc04   :  { %v817_v2 = vld [vmem:[#allocation5 + $0x20] sm:$0xff] }
 0xc05   :  { %v694_v5 = vpack.c.bf16 %v692_v3, %v692_v3 }
 0xc07   :  { %1416 = vmatmul.mubr.bf16.vlgmr.msra.gmra.mxu1 %v694_v5  ;;  %v816_v5 = vld [vmem:[#allocation5 + $0x18] sm:$0xff] }
 0xc08   :  { %921 = vmatprep.mubr.f32.mxu1 %v1594_v1  ;;  %858 = vmatpush1.msra.mxu1 %v843_v47  ;;  %v960_v47 = vld [vmem:[#allocation7 + $0xa0] sm:$0xff] }
 0xc09   :  { %859 = vmatprep.subr.mxu1 %v842_v48  ;;  %v944_v48 = vld [vmem:[#allocation7 + $0x20] sm:$0xff] }
 0xc0a   :  { %860 = vmatpush1.msra.mxu1 %v841_v50  ;;  %v959_v50 = vld [vmem:[#allocation7 + $0x98] sm:$0xff] }
 0xc0b   :  { %861 = vmatprep.subr.mxu1 %v840_v13  ;;  %v943_v13 = vld [vmem:[#allocation7 + $0x18] sm:$0xff] }
 0xc0c   :  { %862 = vmatpush1.msra.mxu1 %v839_v52  ;;  %v958_v52 = vld [vmem:[#allocation7 + $0x90] sm:$0xff] }
 0xc0d   :  { %863 = vmatprep.subr.mxu1 %v838_v42  ;;  %v942_v42 = vld [vmem:[#allocation7 + $0x10] sm:$0xff] }
 0xc0e   :  { %864 = vmatpush1.msra.mxu1 %v837_v14  ;;  %v957_v14 = vld [vmem:[#allocation7 + $0x88] sm:$0xff] }
 0xc0f   :  { %865 = vmatprep.subr.mxu1 %v836_v54  ;;  %v956_v54 = vld [vmem:[#allocation7 + $0x80] sm:$0xff] }
 0xc10   :  { %866 = vmatpush1.msra.mxu1 %v835_v56  ;;  %v848_v56 = vshrl.u32 %v71_v31, 7 }
 0xc11   :  { %867 = vmatprep.subr.mxu1 %v834_v4 }
 0xc12   :  { %868 = vmatpush1.msra.mxu1 %v833_v11  ;;  %v849_v4 = vsub.s32 0, %v848_v56  ;;  %v853_v11 = vsub.s32 1, %v848_v56 }
 0xc13   :  { %869 = vmatprep.subr.mxu1 %v832_v15 }
 0xc14   :  { %870 = vmatpush1.msra.mxu1 %v831_v57 }
 0xc15   :  { %871 = vmatprep.subr.mxu1 %v830_v19 }
 0xcc7   :  { %v729_v8 = vpop.f32.mrf.mxu1 }
 0xcc8   :  { %v735_v10 = vadd.f32 %v729_v8, %v249_v6  ;;  %v815_v6 = vld [vmem:[#allocation5 + $0x10] sm:$0xff]  ;;  %v814_v8 = vld [vmem:[#allocation5 + $0x8] sm:$0xff] }
 0xcc9   :  { %v1417_v17 = vpop.f32.mrf.mxu1 }
 0xcca   :  { %v1099_v18 = vmul.f32 -1.442695, %v735_v10  ;;  %v813_v10 = vld [vmem:[#allocation5] sm:$0xff] }
 0xccb   :  { %v732_v20 = vpop.f32.mrf.mxu1 }
 0xccc   :  { %1498 = vpow2.f32 %v1099_v18 }
 0xccd   :  { %v1418_v21 = vpop.f32.mrf.mxu1 }
 0xcd9   :  { %v1499_v23 = vpop.eup %1498 }
 0xcda   :  { %v739_v24 = vadd.f32 1.0, %v1499_v23 }
 0xcdc   :  { %1500 = vrcp.f32 %v739_v24  ;;  %v971_v24 = vld [vmem:[#allocation7 + $0xf8] sm:$0xff] }
 0xcdd   :  { %1200 = vmatprep.subr.mxu0 %v971_v24 }
 0xce9   :  { %v1501_v26 = vpop.eup %1500 }
 0xcea   :  { %v742_v27 = vmul.f32 %v1501_v26, %v1785_v49  ;;  %v955_v26 = vld [vmem:[#allocation7 + $0x78] sm:$0xff] }
 0xcec   :  { %v743_v9 = vadd.f32 %v742_v27, %v1788_v51  ;;  %v970_v27 = vld [vmem:[#allocation7 + $0xf0] sm:$0xff] }
 0xcee   :  { %744 = vrot.lane.b32.xlu0 %v743_v9, %s1597_s3  ;;  %v749_v16 = vmul.f32 %v743_v9, %v690_v0 }
 0xd60   :  { %v745_v1 = vpop.permute.xlu0 %744 }
 0xd61   :  { %v746_v29 = vmul.f32 %v745_v1, %v743_v9  ;;  %v954_v9 = vld [vmem:[#allocation7 + $0x70] sm:$0xff] }
 0xd63   :  { %747 = vrot.lane.b32.xlu1 %v746_v29, %s1598_s6  ;;  %v953_v29 = vld [vmem:[#allocation7 + $0x68] sm:$0xff] }
 0xdd5   :  { %v748_v30 = vpop.permute.xlu1 %747 }
 0xdd6   :  { %v1953_v32 = vadd.f32 %v749_v16, %v748_v30  ;;  %v968_v16 = vld [vmem:[#allocation7 + $0xe0] sm:$0xff] }
 0xdd7   :  { %v952_v30 = vld [vmem:[#allocation7 + $0x60] sm:$0xff] }
 0xdd8   :  { %1502 = vtanh.f32 %v1953_v32 }
 0xde5   :  { %v1503_v33 = vpop.eup %1502 }
 0xde6   :  { %v752_v34 = vmul.f32 %v1503_v33, %v745_v1  ;;  %v969_v1 = vld [vmem:[#allocation7 + $0xe8] sm:$0xff]  ;;  %v951_v33 = vld [vmem:[#allocation7 + $0x58] sm:$0xff] }
 0xde8   :  { %v754_v35 = vpack.c.bf16 %v752_v34, %v752_v34  ;;  %v966_v34 = vld [vmem:[#allocation7 + $0xd0] sm:$0xff] }
 0xdea   :  { %1436 = vmatmul.mubr.bf16.vlgmr.msra.gmra.mxu0 %v754_v35  ;;  %v950_v35 = vld [vmem:[#allocation7 + $0x50] sm:$0xff] }
 0xdeb   :  { %1201 = vmatpush3.msra.mxu0 %v955_v26 }
 0xdec   :  { %1202 = vmatprep.subr.mxu0 %v970_v27 }
 0xded   :  { %1203 = vmatpush3.msra.mxu0 %v954_v9 }
 0xdee   :  { %1204 = vmatprep.subr.mxu0 %v969_v1 }
 0xdef   :  { %1205 = vmatpush3.msra.mxu0 %v953_v29 }
 0xdf0   :  { %1206 = vmatprep.subr.mxu0 %v968_v16 }
 0xdf1   :  { %1207 = vmatpush3.msra.mxu0 %v952_v30 }
 0xeaa   :  { %v789_v37 = vpop.f32.mrf.mxu0 }
 0xeab   :  { %v795_v38 = vadd.f32 %v789_v37, %v254_v36  ;;  %v965_v36 = vld [vmem:[#allocation7 + $0xc8] sm:$0xff] }
 0xeac   :  { %v1437_v39 = vpop.f32.mrf.mxu0  ;;  %v949_v37 = vld [vmem:[#allocation7 + $0x48] sm:$0xff] }
 0xead   :  { %v1100_v40 = vmul.f32 -1.442695, %v795_v38  ;;  %v964_v38 = vld [vmem:[#allocation7 + $0xc0] sm:$0xff] }
 0xeae   :  { %v792_v41 = vpop.f32.mrf.mxu0  ;;  %v948_v39 = vld [vmem:[#allocation7 + $0x40] sm:$0xff] }
 0xeaf   :  { %1504 = vpow2.f32 %v1100_v40  ;;  %v963_v40 = vld [vmem:[#allocation7 + $0xb8] sm:$0xff] }
 0xeb0   :  { %v1438_v43 = vpop.f32.mrf.mxu0  ;;  %v947_v41 = vld [vmem:[#allocation7 + $0x38] sm:$0xff] }
 0xeb1   :  { %v962_v43 = vld [vmem:[#allocation7 + $0xb0] sm:$0xff] }
 0xebc   :  { %v1505_v44 = vpop.eup %1504 }
 0xebd   :  { %v799_v45 = vadd.f32 1.0, %v1505_v44  ;;  %v946_v44 = vld [vmem:[#allocation7 + $0x30] sm:$0xff] }
 0xebf   :  { %1506 = vrcp.f32 %v799_v45  ;;  %v961_v45 = vld [vmem:[#allocation7 + $0xa8] sm:$0xff] }
 0xecc   :  { %v1507_v53 = vpop.eup %1506 }
 0xecd   :  { %v802_v55 = vmul.f32 %v1507_v53, %v1785_v49  ;;  %v829_v49 = vld [vmem:[#allocation5 + $0x80] sm:$0xff]  ;;  %v941_v53 = vld [vmem:[#allocation7 + $0x8] sm:$0xff] }
 0xece   :  { %872 = vmatpush1.msra.mxu1 %v829_v49 }
 0xecf   :  { %v803_v7 = vadd.f32 %v802_v55, %v1788_v51  ;;  %873 = vmatprep.subr.mxu1 %v828_v58  ;;  %v825_v51 = vld [vmem:[#allocation5 + $0x60] sm:$0xff] }
 0xed0   :  { %874 = vmatpush1.msra.mxu1 %v827_v59  ;;  %v940_v55 = vld [vmem:[#allocation7] sm:$0xff] }
 0xed1   :  { %804 = vrot.lane.b32.xlu0 %v803_v7, %s1597_s3  ;;  %875 = vmatprep.subr.mxu1 %v826_v22  ;;  %v809_v17 = vmul.f32 %v803_v7, %v1953_v32  ;;  %v967_v32 = vld [vmem:[#allocation7 + $0xd8] sm:$0xff] }
 0xed2   :  { %876 = vmatpush1.msra.mxu1 %v825_v51  ;;  %1208 = vmatprep.subr.mxu0 %v967_v32 }
 0xed3   :  { %877 = vmatprep.subr.mxu1 %v824_v60  ;;  %1209 = vmatpush3.msra.mxu0 %v951_v33 }
 0xed4   :  { %878 = vmatpush1.msra.mxu1 %v823_v25  ;;  %1210 = vmatprep.subr.mxu0 %v966_v34 }
 0xed5   :  { %879 = vmatprep.subr.mxu1 %v822_v61  ;;  %1211 = vmatpush3.msra.mxu0 %v950_v35 }
 0xed6   :  { %880 = vmatpush1.msra.mxu1 %v821_v28  ;;  %1212 = vmatprep.subr.mxu0 %v965_v36 }
 0xed7   :  { %881 = vmatprep.subr.mxu1 %v820_v62  ;;  %1213 = vmatpush3.msra.mxu0 %v949_v37 }
 0xed8   :  { %882 = vmatpush1.msra.mxu1 %v819_v12  ;;  %1214 = vmatprep.subr.mxu0 %v964_v38 }
 0xed9   :  { %883 = vmatprep.subr.mxu1 %v818_v63  ;;  %1215 = vmatpush3.msra.mxu0 %v948_v39 }
 0xeda   :  { %884 = vmatpush1.msra.mxu1 %v817_v2  ;;  %1216 = vmatprep.subr.mxu0 %v963_v40 }
 0xedb   :  { %885 = vmatprep.subr.mxu1 %v816_v5  ;;  %1217 = vmatpush3.msra.mxu0 %v947_v41 }
 0xedc   :  { %886 = vmatpush1.msra.mxu1 %v815_v6  ;;  %1218 = vmatprep.subr.mxu0 %v962_v43 }
 0xedd   :  { %887 = vmatprep.subr.mxu1 %v814_v8  ;;  %1219 = vmatpush3.msra.mxu0 %v946_v44 }
 0xede   :  { %888 = vmatpush1.msra.mxu1 %v813_v10  ;;  %1220 = vmatprep.subr.mxu0 %v961_v45 }
 0xedf   :  { %1221 = vmatpush3.msra.mxu0 %v945_v46 }
 0xee0   :  { %1222 = vmatprep.subr.mxu0 %v960_v47 }
 0xee1   :  { %1223 = vmatpush3.msra.mxu0 %v944_v48 }
 0xee2   :  { %1224 = vmatprep.subr.mxu0 %v959_v50 }
 0xee3   :  { %1225 = vmatpush3.msra.mxu0 %v943_v13 }
 0xee4   :  { %1226 = vmatprep.subr.mxu0 %v958_v52 }
 0xee5   :  { %1227 = vmatpush3.msra.mxu0 %v942_v42 }
 0xee6   :  { %1228 = vmatprep.subr.mxu0 %v957_v14 }
 0xee7   :  { %1229 = vmatpush3.msra.mxu0 %v941_v53 }
 0xee8   :  { %1230 = vmatprep.subr.mxu0 %v956_v54 }
 0xee9   :  { %1231 = vmatpush3.msra.mxu0 %v940_v55 }
 0xf43   :  { %v805_v0 = vpop.permute.xlu0 %804 }
 0xf44   :  { %v806_v3 = vmul.f32 %v805_v0, %v803_v7  ;;  %v845_v7 = vld [vmem:[%s1978_s5] sm:$0x3] }
 0xf45   :  { %v850_v15 = vrot.slane %v845_v7, %v849_v4  ;;  %v854_v57 = vrot.slane %v845_v7, %v853_v11 }
 0xf46   :  { %807 = vrot.lane.b32.xlu1 %v806_v3, %s1598_s6 }
 0xfb8   :  { %v808_v18 = vpop.permute.xlu1 %807 }
 0xfb9   :  { %v810_v20 = vadd.f32 %v809_v17, %v808_v18 }
 0xfbb   :  { %1508 = vtanh.f32 %v810_v20 }
 0xfc8   :  { %v1509_v21 = vpop.eup %1508 }
 0xfc9   :  { %v812_v23 = vmul.f32 %v1509_v21, %v805_v0  ;;  %v1103_v0 = vld [vmem:[%s1980_s7] ss:$0 sm:$0xff] }
 0xfcb   :  { %922 = vmatmul.mubr.f32.vlgmr.msra.gmra.mxu1 %v812_v23 }
0x108b   :  { %v923_v19 = vpop.f32.mrf.mxu1 }
0x108c   :  { %v924_v49 = vadd.f32 %v923_v19, %v850_v15 }
0x108d   :  { %v925_v58 = vpop.f32.mrf.mxu1 }
0x108e   :  { %v1101_v59 = vmul.f32 -1.442695, %v924_v49  ;;  %v926_v22 = vadd.f32 %v925_v58, %v854_v57 }
0x1090   :  { %1510 = vpow2.f32 %v1101_v59  ;;  %v1102_v51 = vmul.f32 -1.442695, %v926_v22 }
0x1092   :  { %1512 = vpow2.f32 %v1102_v51 }
0x109d   :  { %v1511_v60 = vpop.eup %1510 }
0x109e   :  { %v934_v61 = vadd.f32 1.0, %v1511_v60 }
0x109f   :  { %v1513_v25 = vpop.eup %1512 }
0x10a0   :  { %v935_v31 = vadd.f32 1.0, %v1513_v25 }
0x10a2   :  { %1514 = vrcp.f32 %v935_v31 }
0x10a3   :  { %1516 = vrcp.f32 %v934_v61 }
0x10af   :  { %v1515_v28 = vpop.eup %1514 }
0x10b0   :  { %v1517_v62 = vpop.eup %1516  ;;  %1043 = vmatprep.mubr.f32.mxu0 %v1515_v28 }
0x10b1   :  { %1044 = vmatmul.mubr.f32.vlgmr.msra.gmra.mxu0 %v1517_v62 }
0x1171   :  { %v1232_v12 = vpop.f32.mrf.mxu0 }
0x1173   :  { %v1233_v63 = vpop.f32.mrf.mxu0 }
0x1174   :  { %v1234_v2 = vadd.f32 %v1233_v63, %v1232_v12 }
0x1176   :  { %v1046_v3 = vadd.f32 %v1234_v2, %v1103_v0 }
0x1178   :  { %1049 = vmax.xlane.f32.xlu0 %v1046_v3 }
0x1201   :  { %v1050_v5 = vpop.xlane.xlu0 %1049 }
0x1202   :  { %v1051_v6 = vsub.f32 %v1046_v3, %v1050_v5 }
0x1204   :  { %v1052_v8 = vmul.f32 1.442695, %v1051_v6 }
0x1206   :  { %1518 = vpow2.f32 %v1052_v8 }
0x1213   :  { %v1519_v10 = vpop.eup %1518 }
0x1214   :  { %1054 = vadd.xlane.f32.xlu1 %v1519_v10 }
0x129d   :  { %v1055_v17 = vpop.xlane.xlu1 %1054 }
0x129e   :  { %1520 = vrcp.f32 %v1055_v17 }
0x12ab   :  { %v1521_v18 = vpop.eup %1520 }
0x12ac   :  { %v1057_v20 = vmul.f32 %v1521_v18, %v1055_v17 }
0x12ae   :  { %v1058_v21 = vsub.f32 2.0, %v1057_v20 }
0x12b0   :  { %v1059_v23 = vmul.f32 %v1521_v18, %v1058_v21 }
0x12b2   :  { %v1060_v24 = vmul.f32 %v1519_v10, %v1059_v23 }
0x12b4   :  { %1061 = vst [vmem:[%s1981_s8] sm:$0xff] %v1060_v24 }
0x12b5   :  { %1066 = vsyncpa [#allocation4], 1 }
0x12b6   :  { %1067 = vsyncpa [#allocation6], 1 }

</bundles_post_ra>
